<compile_context>
chip_gen: v7x
topology: tpu7x:2x2x1
jax: 0.10.0
libtpu: 0.0.40
codegen_flags: <defaults>
</compile_context>

<pallas_src>
import functools

import jax
import jax.numpy as jnp
from jax import lax
from jax.experimental import pallas as pl
from jax.experimental.pallas import tpu as pltpu


def _round_up(x, m):
    return ((x + m - 1) // m) * m


def _ffn_kernel(x_hbm, w1_ref, b1_ref, w2_ref, b2_ref, g_ref, bt_ref, o_ref,
                x_scr, hid_scr, sem, *opt_scr,
                k1, k2, p2, tile_t, halo, halo_a, d_in_p, d_hid_p,
                inv_d, eps, cdt, use_im2col):
    """One (batch, time-tile) grid step.

    x_hbm   : (B, T_pad, d_in_p) HBM ref (memory_space=ANY), manual DMA.
    w1_ref  : (k1*d_in_p, d_hid_p)   conv1 taps, tap-major flattened.
    b1_ref  : (1, d_hid_p)           f32
    w2_ref  : (k2*d_hid_p, d_in_p)   conv2 taps, tap-major flattened.
    b2_ref  : (1, d_in_p)            f32
    g_ref, bt_ref : (1, d_in_p)      LayerNorm gamma / beta (f32)
    o_ref   : (1, tile_t, d_in_p)
    x_scr   : (tile_t + 2*halo_a, d_in_p) VMEM input window (incl. halo)
    hid_scr : (tile_t + 2*p2, d_hid_p)    VMEM relu(conv1) in compute dtype
    sem     : DMA semaphores (3,)  [main, left halo, right halo]
    opt_scr : (im2col_scr,) when use_im2col
    """
    b = pl.program_id(0)
    t = pl.program_id(1)
    n_t = pl.num_programs(1)
    p1 = (k1 - 1) // 2
    th = tile_t + 2 * p2            # rows of conv1 output needed by this tile
    lo = halo_a - p1 - p2           # first x_scr row read by tap j = 0

    # ---- manual halo'd input DMA (x is unpadded in HBM) --------------------
    def main_copy():
        return pltpu.make_async_copy(
            x_hbm.at[b, pl.ds(t * tile_t, tile_t), :],
            x_scr.at[pl.ds(halo_a, tile_t), :], sem.at[0])

    def left_copy():
        return pltpu.make_async_copy(
            x_hbm.at[b, pl.ds(t * tile_t - halo, halo), :],
            x_scr.at[pl.ds(halo_a - halo, halo), :], sem.at[1])

    def right_copy():
        return pltpu.make_async_copy(
            x_hbm.at[b, pl.ds((t + 1) * tile_t, halo), :],
            x_scr.at[pl.ds(halo_a + tile_t, halo), :], sem.at[2])

    main_copy().start()
    if halo > 0:
        @pl.when(t > 0)
        def _():
            left_copy().start()

        @pl.when(t == 0)            # 'same'-conv zero padding at sequence start
        def _():
            x_scr[0:halo_a, :] = jnp.zeros((halo_a, d_in_p), x_scr.dtype)

        @pl.when(t < n_t - 1)
        def _():
            right_copy().start()

        @pl.when(t == n_t - 1)      # 'same'-conv zero padding at sequence end
        def _():
            x_scr[halo_a + tile_t:, :] = jnp.zeros((halo_a, d_in_p),
                                                   x_scr.dtype)

    main_copy().wait()
    if halo > 0:
        @pl.when(t > 0)
        def _():
            left_copy().wait()

        @pl.when(t < n_t - 1)
        def _():
            right_copy().wait()

    # ---- conv1 (kernel k1, 'same' padding) ---------------------------------
    if use_im2col:
        # Fuse the k1 taps into one MXU matmul with K = k1 * d_in_p.
        im2col = opt_scr[0]
        for j in range(k1):
            im2col[:, j * d_in_p:(j + 1) * d_in_p] = (
                x_scr[lo + j:lo + j + th, :].astype(cdt))
        hid = jnp.dot(im2col[...], w1_ref[...],
                      preferred_element_type=jnp.float32)
    else:
        hid = jnp.zeros((th, d_hid_p), jnp.float32)
        for j in range(k1):
            hid = hid + jnp.dot(
                x_scr[lo + j:lo + j + th, :].astype(cdt),
                w1_ref[j * d_in_p:(j + 1) * d_in_p, :],
                preferred_element_type=jnp.float32)
    hid = jnp.maximum(hid + b1_ref[...], 0.0)          # bias + ReLU in f32
    hid_scr[...] = hid.astype(cdt)

    # ---- conv2 (kernel k2, 'same'); hid_scr already carries the p2 halo ----
    out = jnp.zeros((tile_t, d_in_p), jnp.float32)
    for j in range(k2):
        out = out + jnp.dot(
            hid_scr[j:j + tile_t, :],
            w2_ref[j * d_hid_p:(j + 1) * d_hid_p, :],
            preferred_element_type=jnp.float32)
    out = out + b2_ref[...]

    # ---- dropout (identity, eval) + residual + LayerNorm over true d_in ----
    out = out + x_scr[halo_a:halo_a + tile_t, :].astype(jnp.float32)
    mean = jnp.sum(out, axis=-1, keepdims=True) * inv_d
    ex2 = jnp.sum(out * out, axis=-1, keepdims=True) * inv_d
    var = ex2 - mean * mean          # padded lanes are exactly 0 -> sums ok
    normed = (out - mean) * lax.rsqrt(var + eps)
    o_ref[0] = (normed * g_ref[...] + bt_ref[...]).astype(o_ref.dtype)


def positionwise_ffn(x, params, kernel_size, *, eps=1e-5, tile_t=256,
                     compute_dtype=jnp.bfloat16):
    """x: (B, T, d_in).  params: see init_params.  Returns (B, T, d_in)."""
    B, T, d_in = x.shape
    k1, k2 = kernel_size
    assert k1 % 2 == 1 and k2 % 2 == 1, "odd kernel sizes keep 'same' length"
    p1, p2 = (k1 - 1) // 2, (k2 - 1) // 2
    p_tot = p1 + p2
    d_hid = params["w1"].shape[2]

    # lane-dense channel padding (multiples of 128)
    d_in_p = _round_up(d_in, 128)
    d_hid_p = _round_up(d_hid, 128)

    # time tiling (multiple of 8, >= total halo)
    tile_t = max(8, min(int(tile_t), _round_up(T, 8)))
    tile_t = _round_up(max(tile_t, p_tot), 8)
    T_pad = _round_up(T, tile_t)
    n_t = T_pad // tile_t

    halo = p_tot
    halo_a = _round_up(p_tot, 8) if p_tot > 0 else 0   # sublane-aligned halo
    rows = tile_t + 2 * halo_a
    th = tile_t + 2 * p2

    # activations: pad only when shapes are not already aligned
    if T_pad != T or d_in_p != d_in:
        x_in = jnp.pad(x, ((0, 0), (0, T_pad - T), (0, d_in_p - d_in)))
    else:
        x_in = x

    cdt = compute_dtype
    # weights: pad channels with zeros, flatten taps (tap-major), cast
    w1 = jnp.pad(params["w1"],
                 ((0, 0), (0, d_in_p - d_in), (0, d_hid_p - d_hid)))
    w1_flat = w1.astype(cdt).reshape(k1 * d_in_p, d_hid_p)
    w2 = jnp.pad(params["w2"],
                 ((0, 0), (0, d_hid_p - d_hid), (0, d_in_p - d_in)))
    w2_flat = w2.astype(cdt).reshape(k2 * d_hid_p, d_in_p)
    b1 = jnp.pad(params["b1"], ((0, 0), (0, d_hid_p - d_hid))).astype(jnp.float32)
    b2 = jnp.pad(params["b2"], ((0, 0), (0, d_in_p - d_in))).astype(jnp.float32)
    gamma = jnp.pad(params["gamma"], ((0, 0), (0, d_in_p - d_in))).astype(jnp.float32)
    beta = jnp.pad(params["beta"], ((0, 0), (0, d_in_p - d_in))).astype(jnp.float32)

    use_im2col = (k1 > 1) and (d_in_p < 256)

    kernel = functools.partial(
        _ffn_kernel, k1=k1, k2=k2, p2=p2, tile_t=tile_t, halo=halo,
        halo_a=halo_a, d_in_p=d_in_p, d_hid_p=d_hid_p,
        inv_d=1.0 / float(d_in), eps=eps, cdt=cdt, use_im2col=use_im2col)

    dsz = lambda dt: jnp.dtype(dt).itemsize
    scratch_shapes = [
        pltpu.VMEM((rows, d_in_p), x_in.dtype),   # input window (+halo)
        pltpu.VMEM((th, d_hid_p), cdt),           # relu(conv1) (+p2 halo)
        pltpu.SemaphoreType.DMA((3,)),
    ]
    if use_im2col:
        scratch_shapes.append(pltpu.VMEM((th, k1 * d_in_p), cdt))

    # explicit VMEM budget: double-buffered weights/output + scratches
    vmem_est = (
        2 * (k1 * d_in_p * d_hid_p + k2 * d_hid_p * d_in_p) * dsz(cdt)
        + 2 * 8 * (d_hid_p + 3 * d_in_p) * 4
        + rows * d_in_p * dsz(x_in.dtype)
        + th * d_hid_p * dsz(cdt)
        + (th * k1 * d_in_p * dsz(cdt) if use_im2col else 0)
        + 2 * tile_t * d_in_p * dsz(x_in.dtype))
    vmem_limit = int(min(max(int(vmem_est * 1.25) + (2 << 20), 16 << 20),
                         112 << 20))

    out = pl.pallas_call(
        kernel,
        out_shape=jax.ShapeDtypeStruct((B, T_pad, d_in_p), x.dtype),
        grid_spec=pltpu.PrefetchScalarGridSpec(
            num_scalar_prefetch=0,
            grid=(B, n_t),
            in_specs=[
                pl.BlockSpec(memory_space=pl.ANY),                    # x (HBM)
                pl.BlockSpec((k1 * d_in_p, d_hid_p), lambda b, t: (0, 0)),
                pl.BlockSpec((1, d_hid_p), lambda b, t: (0, 0)),
                pl.BlockSpec((k2 * d_hid_p, d_in_p), lambda b, t: (0, 0)),
                pl.BlockSpec((1, d_in_p), lambda b, t: (0, 0)),
                pl.BlockSpec((1, d_in_p), lambda b, t: (0, 0)),
                pl.BlockSpec((1, d_in_p), lambda b, t: (0, 0)),
            ],
            out_specs=pl.BlockSpec((1, tile_t, d_in_p),
                                   lambda b, t: (b, t, 0)),
            scratch_shapes=scratch_shapes,
        ),
        compiler_params=pltpu.CompilerParams(
            dimension_semantics=("parallel", "parallel"),
            vmem_limit_bytes=vmem_limit),
    )(x_in, w1_flat, b1, w2_flat, b2, gamma, beta)

    if T_pad != T or d_in_p != d_in:
        out = out[:, :T, :d_in]
    return out


def init_params(key, d_in, d_hid, kernel_size):
    """PyTorch-Conv1d-shaped init; weights stored as (k, in_ch, out_ch)."""
    k1, k2 = kernel_size
    k_w1, k_w2, k_b1, k_b2 = jax.random.split(key, 4)
    s1 = 1.0 / jnp.sqrt(d_in * k1)
    s2 = 1.0 / jnp.sqrt(d_hid * k2)
    w1_torch = jax.random.uniform(k_w1, (d_hid, d_in, k1), jnp.float32, -s1, s1)
    w2_torch = jax.random.uniform(k_w2, (d_in, d_hid, k2), jnp.float32, -s2, s2)
    return {
        "w1": jnp.transpose(w1_torch, (2, 1, 0)),   # (k1, d_in, d_hid)
        "b1": jax.random.uniform(k_b1, (1, d_hid), jnp.float32, -s1, s1),
        "w2": jnp.transpose(w2_torch, (2, 1, 0)),   # (k2, d_hid, d_in)
        "b2": jax.random.uniform(k_b2, (1, d_in), jnp.float32, -s2, s2),
        "gamma": jnp.ones((1, d_in), jnp.float32),
        "beta": jnp.zeros((1, d_in), jnp.float32),
    }


def reference_ffn(x, params, kernel_size, eps=1e-5,
                  compute_dtype=jnp.bfloat16):
    """Pure-JAX reference (mirrors the PyTorch forward, eval-mode dropout),
    with matmul operands cast to compute_dtype and f32 accumulation so it is
    numerically comparable to the kernel."""
    k1, k2 = kernel_size
    p1, p2 = (k1 - 1) // 2, (k2 - 1) // 2
    B, T, d_in = x.shape

    def conv(inp, w, b, p, k):          # inp (B,T,Cin), w (k,Cin,Cout)
        inp_p = jnp.pad(inp, ((0, 0), (p, p), (0, 0)))
        out = sum(
            jnp.einsum("btc,cd->btd",
                       inp_p[:, j:j + T, :].astype(compute_dtype),
                       w[j].astype(compute_dtype),
                       preferred_element_type=jnp.float32)
            for j in range(k))
        return out + b.astype(jnp.float32)

    h = jax.nn.relu(conv(x, params["w1"], params["b1"], p1, k1))
    h = h.astype(compute_dtype).astype(jnp.float32)  # hid stored bf16 in-kernel
    o = conv(h, params["w2"], params["b2"], p2, k2) + x.astype(jnp.float32)
    mean = jnp.mean(o, axis=-1, keepdims=True)
    var = jnp.mean(jnp.square(o - mean), axis=-1, keepdims=True)
    y = (o - mean) * lax.rsqrt(var + eps) * params["gamma"] + params["beta"]
    return y.astype(x.dtype)


if __name__ == "__main__":
    B, T, d_in, d_hid = 2, 48, 32, 64
    kernel_size = (9, 1)            # FastSpeech-style conv FFN

    key = jax.random.PRNGKey(0)
    k_x, k_p = jax.random.split(key)
    x = jax.random.normal(k_x, (B, T, d_in), jnp.float32)
    params = init_params(k_p, d_in, d_hid, kernel_size)

    # small tile_t so the multi-tile / halo DMA path is exercised (3 tiles)
    out = positionwise_ffn(x, params, kernel_size, tile_t=16)
    out = jax.block_until_ready(out)

    ref = reference_ffn(x, params, kernel_size)
    assert out.shape == (B, T, d_in)
    err = float(jnp.max(jnp.abs(out - ref)))
    assert err < 5e-2, f"max abs err {err}"

    print("KERNEL_OK")
</pallas_src>

<mosaic_0001>
module attributes {stable_mosaic.version = 11 : i64} {
  func.func @_ffn_kernel(%arg0: i32, %arg1: i32, %arg2: memref<2x48x128xf32, #tpu.memory_space<any>>, %arg3: memref<1152x128xbf16, #tpu.memory_space<vmem>>, %arg4: memref<1x128xf32, #tpu.memory_space<vmem>>, %arg5: memref<128x128xbf16, #tpu.memory_space<vmem>>, %arg6: memref<1x128xf32, #tpu.memory_space<vmem>>, %arg7: memref<1x128xf32, #tpu.memory_space<vmem>>, %arg8: memref<1x128xf32, #tpu.memory_space<vmem>>, %arg9: memref<1x16x128xf32, #tpu.memory_space<vmem>>, %arg10: memref<32x128xf32, #tpu.memory_space<vmem>>, %arg11: memref<16x128xbf16, #tpu.memory_space<vmem>>, %arg12: memref<3x!tpu.dma_semaphore, #tpu.memory_space<semaphore_mem>>, %arg13: memref<16x1152xbf16, #tpu.memory_space<vmem>>) attributes {dimension_semantics = [#tpu.dimension_semantics<parallel>, #tpu.dimension_semantics<parallel>], iteration_bounds = array<i64: 2, 3>, scalar_prefetch = 0 : i64, scratch_operands = 4 : i64, tpu.core_type = #tpu.core_type<tc>, window_params = [{}, {pipeline_mode = #tpu.pipeline_mode<synchronous>, transform_indices = @transform_1, window_bounds = array<i64: 1152, 128>}, {pipeline_mode = #tpu.pipeline_mode<synchronous>, transform_indices = @transform_2, window_bounds = array<i64: 1, 128>}, {pipeline_mode = #tpu.pipeline_mode<synchronous>, transform_indices = @transform_3, window_bounds = array<i64: 128, 128>}, {pipeline_mode = #tpu.pipeline_mode<synchronous>, transform_indices = @transform_4, window_bounds = array<i64: 1, 128>}, {pipeline_mode = #tpu.pipeline_mode<synchronous>, transform_indices = @transform_5, window_bounds = array<i64: 1, 128>}, {pipeline_mode = #tpu.pipeline_mode<synchronous>, transform_indices = @transform_6, window_bounds = array<i64: 1, 128>}, {transform_indices = @transform_7, window_bounds = array<i64: 1, 16, 128>}]} {
    %c16_i32 = arith.constant 16 : i32
    %0 = arith.muli %arg1, %c16_i32 : i32
    %c0_i32 = arith.constant 0 : i32
    %c0_i32_0 = arith.constant 0 : i32
    %1 = tpu.memref_slice %arg2[%arg0, %0, %c0_i32_0] : memref<2x48x128xf32, #tpu.memory_space<any>> -> memref<1x16x128xf32, #tpu.memory_space<any>>
    %2 = tpu.memref_squeeze %1 : memref<1x16x128xf32, #tpu.memory_space<any>> -> memref<16x128xf32, #tpu.memory_space<any>>
    %c8_i32 = arith.constant 8 : i32
    %c0_i32_1 = arith.constant 0 : i32
    %3 = tpu.memref_slice %arg10[%c8_i32, %c0_i32_1] : memref<32x128xf32, #tpu.memory_space<vmem>> -> memref<16x128xf32, #tpu.memory_space<vmem>>
    %4 = tpu.memref_slice %arg12[%c0_i32] : memref<3x!tpu.dma_semaphore, #tpu.memory_space<semaphore_mem>> -> memref<1x!tpu.dma_semaphore, #tpu.memory_space<semaphore_mem>>
    %5 = tpu.memref_squeeze %4 : memref<1x!tpu.dma_semaphore, #tpu.memory_space<semaphore_mem>> -> memref<!tpu.dma_semaphore, #tpu.memory_space<semaphore_mem>>
    tpu.enqueue_dma source(%2 : memref<16x128xf32, #tpu.memory_space<any>>) target(%3 : memref<16x128xf32, #tpu.memory_space<vmem>>) target_semaphore(%5 : memref<!tpu.dma_semaphore, #tpu.memory_space<semaphore_mem>>)
    %c0_i32_2 = arith.constant 0 : i32
    %6 = arith.cmpi sgt, %arg1, %c0_i32_2 : i32
    %7 = arith.extui %6 : i1 to i32
    %c0_i32_3 = arith.constant 0 : i32
    %8 = arith.cmpi ne, %7, %c0_i32_3 : i32
    scf.if %8 {
      %c16_i32_67 = arith.constant 16 : i32
      %104 = arith.muli %arg1, %c16_i32_67 : i32
      %c4_i32 = arith.constant 4 : i32
      %105 = arith.subi %104, %c4_i32 : i32
      %c1_i32 = arith.constant 1 : i32
      %c0_i32_68 = arith.constant 0 : i32
      %106 = tpu.memref_slice %arg2[%arg0, %105, %c0_i32_68] : memref<2x48x128xf32, #tpu.memory_space<any>> -> memref<1x4x128xf32, #tpu.memory_space<any>>
      %107 = tpu.memref_squeeze %106 : memref<1x4x128xf32, #tpu.memory_space<any>> -> memref<4x128xf32, #tpu.memory_space<any>>
      %c4_i32_69 = arith.constant 4 : i32
      %c0_i32_70 = arith.constant 0 : i32
      %108 = tpu.memref_slice %arg10[%c4_i32_69, %c0_i32_70] : memref<32x128xf32, #tpu.memory_space<vmem>> -> memref<4x128xf32, #tpu.memory_space<vmem>>
      %109 = tpu.memref_slice %arg12[%c1_i32] : memref<3x!tpu.dma_semaphore, #tpu.memory_space<semaphore_mem>> -> memref<1x!tpu.dma_semaphore, #tpu.memory_space<semaphore_mem>>
      %110 = tpu.memref_squeeze %109 : memref<1x!tpu.dma_semaphore, #tpu.memory_space<semaphore_mem>> -> memref<!tpu.dma_semaphore, #tpu.memory_space<semaphore_mem>>
      tpu.enqueue_dma source(%107 : memref<4x128xf32, #tpu.memory_space<any>>) target(%108 : memref<4x128xf32, #tpu.memory_space<vmem>>) target_semaphore(%110 : memref<!tpu.dma_semaphore, #tpu.memory_space<semaphore_mem>>)
    } else {
    }
    %c0_i32_4 = arith.constant 0 : i32
    %9 = arith.cmpi eq, %arg1, %c0_i32_4 : i32
    %10 = arith.extui %9 : i1 to i32
    %c0_i32_5 = arith.constant 0 : i32
    %11 = arith.cmpi ne, %10, %c0_i32_5 : i32
    scf.if %11 {
      %cst_67 = arith.constant 0.000000e+00 : f32
      %104 = vector.broadcast %cst_67 : f32 to vector<8x128xf32>
      %c0_68 = arith.constant 0 : index
      %c0_69 = arith.constant 0 : index
      %105 = vector.load %arg10[%c0_68, %c0_69] : memref<32x128xf32, #tpu.memory_space<vmem>>, vector<8x128xf32>
      tpu.vector_store %arg10[%c0_68, %c0_69], %104 {strides = array<i32>} : memref<32x128xf32, #tpu.memory_space<vmem>>, vector<8x128xf32>,
    } else {
    }
    %c2_i32 = arith.constant 2 : i32
    %12 = arith.cmpi slt, %arg1, %c2_i32 : i32
    %13 = arith.extui %12 : i1 to i32
    %c0_i32_6 = arith.constant 0 : i32
    %14 = arith.cmpi ne, %13, %c0_i32_6 : i32
    scf.if %14 {
      %c1_i32 = arith.constant 1 : i32
      %104 = arith.addi %arg1, %c1_i32 : i32
      %c16_i32_67 = arith.constant 16 : i32
      %105 = arith.muli %104, %c16_i32_67 : i32
      %c2_i32_68 = arith.constant 2 : i32
      %c0_i32_69 = arith.constant 0 : i32
      %106 = tpu.memref_slice %arg2[%arg0, %105, %c0_i32_69] : memref<2x48x128xf32, #tpu.memory_space<any>> -> memref<1x4x128xf32, #tpu.memory_space<any>>
      %107 = tpu.memref_squeeze %106 : memref<1x4x128xf32, #tpu.memory_space<any>> -> memref<4x128xf32, #tpu.memory_space<any>>
      %c24_i32 = arith.constant 24 : i32
      %c0_i32_70 = arith.constant 0 : i32
      %108 = tpu.memref_slice %arg10[%c24_i32, %c0_i32_70] : memref<32x128xf32, #tpu.memory_space<vmem>> -> memref<4x128xf32, #tpu.memory_space<vmem>>
      %109 = tpu.memref_slice %arg12[%c2_i32_68] : memref<3x!tpu.dma_semaphore, #tpu.memory_space<semaphore_mem>> -> memref<1x!tpu.dma_semaphore, #tpu.memory_space<semaphore_mem>>
      %110 = tpu.memref_squeeze %109 : memref<1x!tpu.dma_semaphore, #tpu.memory_space<semaphore_mem>> -> memref<!tpu.dma_semaphore, #tpu.memory_space<semaphore_mem>>
      tpu.enqueue_dma source(%107 : memref<4x128xf32, #tpu.memory_space<any>>) target(%108 : memref<4x128xf32, #tpu.memory_space<vmem>>) target_semaphore(%110 : memref<!tpu.dma_semaphore, #tpu.memory_space<semaphore_mem>>)
    } else {
    }
    %c2_i32_7 = arith.constant 2 : i32
    %15 = arith.cmpi eq, %arg1, %c2_i32_7 : i32
    %16 = arith.extui %15 : i1 to i32
    %c0_i32_8 = arith.constant 0 : i32
    %17 = arith.cmpi ne, %16, %c0_i32_8 : i32
    scf.if %17 {
      %cst_67 = arith.constant 0.000000e+00 : f32
      %104 = vector.broadcast %cst_67 : f32 to vector<8x128xf32>
      %c24 = arith.constant 24 : index
      %c0_68 = arith.constant 0 : index
      %105 = vector.load %arg10[%c24, %c0_68] : memref<32x128xf32, #tpu.memory_space<vmem>>, vector<8x128xf32>
      tpu.vector_store %arg10[%c24, %c0_68], %104 {strides = array<i32>} : memref<32x128xf32, #tpu.memory_space<vmem>>, vector<8x128xf32>,
    } else {
    }
    %c16_i32_9 = arith.constant 16 : i32
    %18 = arith.muli %arg1, %c16_i32_9 : i32
    %c0_i32_10 = arith.constant 0 : i32
    %c0_i32_11 = arith.constant 0 : i32
    %19 = tpu.memref_slice %arg2[%arg0, %18, %c0_i32_11] : memref<2x48x128xf32, #tpu.memory_space<any>> -> memref<1x16x128xf32, #tpu.memory_space<any>>
    %20 = tpu.memref_squeeze %19 : memref<1x16x128xf32, #tpu.memory_space<any>> -> memref<16x128xf32, #tpu.memory_space<any>>
    %c8_i32_12 = arith.constant 8 : i32
    %c0_i32_13 = arith.constant 0 : i32
    %21 = tpu.memref_slice %arg10[%c8_i32_12, %c0_i32_13] : memref<32x128xf32, #tpu.memory_space<vmem>> -> memref<16x128xf32, #tpu.memory_space<vmem>>
    %22 = tpu.memref_slice %arg12[%c0_i32_10] : memref<3x!tpu.dma_semaphore, #tpu.memory_space<semaphore_mem>> -> memref<1x!tpu.dma_semaphore, #tpu.memory_space<semaphore_mem>>
    %23 = tpu.memref_squeeze %22 : memref<1x!tpu.dma_semaphore, #tpu.memory_space<semaphore_mem>> -> memref<!tpu.dma_semaphore, #tpu.memory_space<semaphore_mem>>
    tpu.wait_dma2 semaphore(%23 : memref<!tpu.dma_semaphore, #tpu.memory_space<semaphore_mem>>) src(%20 : memref<16x128xf32, #tpu.memory_space<any>>) dst(%21 : memref<16x128xf32, #tpu.memory_space<vmem>>)
    %c0_i32_14 = arith.constant 0 : i32
    %24 = arith.cmpi sgt, %arg1, %c0_i32_14 : i32
    %25 = arith.extui %24 : i1 to i32
    %c0_i32_15 = arith.constant 0 : i32
    %26 = arith.cmpi ne, %25, %c0_i32_15 : i32
    scf.if %26 {
      %c16_i32_67 = arith.constant 16 : i32
      %104 = arith.muli %arg1, %c16_i32_67 : i32
      %c4_i32 = arith.constant 4 : i32
      %105 = arith.subi %104, %c4_i32 : i32
      %c1_i32 = arith.constant 1 : i32
      %c0_i32_68 = arith.constant 0 : i32
      %106 = tpu.memref_slice %arg2[%arg0, %105, %c0_i32_68] : memref<2x48x128xf32, #tpu.memory_space<any>> -> memref<1x4x128xf32, #tpu.memory_space<any>>
      %107 = tpu.memref_squeeze %106 : memref<1x4x128xf32, #tpu.memory_space<any>> -> memref<4x128xf32, #tpu.memory_space<any>>
      %c4_i32_69 = arith.constant 4 : i32
      %c0_i32_70 = arith.constant 0 : i32
      %108 = tpu.memref_slice %arg10[%c4_i32_69, %c0_i32_70] : memref<32x128xf32, #tpu.memory_space<vmem>> -> memref<4x128xf32, #tpu.memory_space<vmem>>
      %109 = tpu.memref_slice %arg12[%c1_i32] : memref<3x!tpu.dma_semaphore, #tpu.memory_space<semaphore_mem>> -> memref<1x!tpu.dma_semaphore, #tpu.memory_space<semaphore_mem>>
      %110 = tpu.memref_squeeze %109 : memref<1x!tpu.dma_semaphore, #tpu.memory_space<semaphore_mem>> -> memref<!tpu.dma_semaphore, #tpu.memory_space<semaphore_mem>>
      tpu.wait_dma2 semaphore(%110 : memref<!tpu.dma_semaphore, #tpu.memory_space<semaphore_mem>>) src(%107 : memref<4x128xf32, #tpu.memory_space<any>>) dst(%108 : memref<4x128xf32, #tpu.memory_space<vmem>>)
    } else {
    }
    %c2_i32_16 = arith.constant 2 : i32
    %27 = arith.cmpi slt, %arg1, %c2_i32_16 : i32
    %28 = arith.extui %27 : i1 to i32
    %c0_i32_17 = arith.constant 0 : i32
    %29 = arith.cmpi ne, %28, %c0_i32_17 : i32
    scf.if %29 {
      %c1_i32 = arith.constant 1 : i32
      %104 = arith.addi %arg1, %c1_i32 : i32
      %c16_i32_67 = arith.constant 16 : i32
      %105 = arith.muli %104, %c16_i32_67 : i32
      %c2_i32_68 = arith.constant 2 : i32
      %c0_i32_69 = arith.constant 0 : i32
      %106 = tpu.memref_slice %arg2[%arg0, %105, %c0_i32_69] : memref<2x48x128xf32, #tpu.memory_space<any>> -> memref<1x4x128xf32, #tpu.memory_space<any>>
      %107 = tpu.memref_squeeze %106 : memref<1x4x128xf32, #tpu.memory_space<any>> -> memref<4x128xf32, #tpu.memory_space<any>>
      %c24_i32 = arith.constant 24 : i32
      %c0_i32_70 = arith.constant 0 : i32
      %108 = tpu.memref_slice %arg10[%c24_i32, %c0_i32_70] : memref<32x128xf32, #tpu.memory_space<vmem>> -> memref<4x128xf32, #tpu.memory_space<vmem>>
      %109 = tpu.memref_slice %arg12[%c2_i32_68] : memref<3x!tpu.dma_semaphore, #tpu.memory_space<semaphore_mem>> -> memref<1x!tpu.dma_semaphore, #tpu.memory_space<semaphore_mem>>
      %110 = tpu.memref_squeeze %109 : memref<1x!tpu.dma_semaphore, #tpu.memory_space<semaphore_mem>> -> memref<!tpu.dma_semaphore, #tpu.memory_space<semaphore_mem>>
      tpu.wait_dma2 semaphore(%110 : memref<!tpu.dma_semaphore, #tpu.memory_space<semaphore_mem>>) src(%107 : memref<4x128xf32, #tpu.memory_space<any>>) dst(%108 : memref<4x128xf32, #tpu.memory_space<vmem>>)
    } else {
    }
    %c4 = arith.constant 4 : index
    %c0 = arith.constant 0 : index
    %30 = vector.load %arg10[%c4, %c0] : memref<32x128xf32, #tpu.memory_space<vmem>>, vector<16x128xf32>
    %31 = arith.truncf %30 : vector<16x128xf32> to vector<16x128xbf16>
    %c0_18 = arith.constant 0 : index
    %c0_19 = arith.constant 0 : index
    %32 = vector.load %arg13[%c0_18, %c0_19] : memref<16x1152xbf16, #tpu.memory_space<vmem>>, vector<16x128xbf16>
    tpu.vector_store %arg13[%c0_18, %c0_19], %31 {strides = array<i32>} : memref<16x1152xbf16, #tpu.memory_space<vmem>>, vector<16x128xbf16>,
    %c5 = arith.constant 5 : index
    %c0_20 = arith.constant 0 : index
    %33 = vector.load %arg10[%c5, %c0_20] : memref<32x128xf32, #tpu.memory_space<vmem>>, vector<16x128xf32>
    %34 = arith.truncf %33 : vector<16x128xf32> to vector<16x128xbf16>
    %c0_21 = arith.constant 0 : index
    %c128 = arith.constant 128 : index
    %35 = vector.load %arg13[%c0_21, %c128] : memref<16x1152xbf16, #tpu.memory_space<vmem>>, vector<16x128xbf16>
    tpu.vector_store %arg13[%c0_21, %c128], %34 {strides = array<i32>} : memref<16x1152xbf16, #tpu.memory_space<vmem>>, vector<16x128xbf16>,
    %c6 = arith.constant 6 : index
    %c0_22 = arith.constant 0 : index
    %36 = vector.load %arg10[%c6, %c0_22] : memref<32x128xf32, #tpu.memory_space<vmem>>, vector<16x128xf32>
    %37 = arith.truncf %36 : vector<16x128xf32> to vector<16x128xbf16>
    %c0_23 = arith.constant 0 : index
    %c256 = arith.constant 256 : index
    %38 = vector.load %arg13[%c0_23, %c256] : memref<16x1152xbf16, #tpu.memory_space<vmem>>, vector<16x128xbf16>
    tpu.vector_store %arg13[%c0_23, %c256], %37 {strides = array<i32>} : memref<16x1152xbf16, #tpu.memory_space<vmem>>, vector<16x128xbf16>,
    %c7 = arith.constant 7 : index
    %c0_24 = arith.constant 0 : index
    %39 = vector.load %arg10[%c7, %c0_24] : memref<32x128xf32, #tpu.memory_space<vmem>>, vector<16x128xf32>
    %40 = arith.truncf %39 : vector<16x128xf32> to vector<16x128xbf16>
    %c0_25 = arith.constant 0 : index
    %c384 = arith.constant 384 : index
    %41 = vector.load %arg13[%c0_25, %c384] : memref<16x1152xbf16, #tpu.memory_space<vmem>>, vector<16x128xbf16>
    tpu.vector_store %arg13[%c0_25, %c384], %40 {strides = array<i32>} : memref<16x1152xbf16, #tpu.memory_space<vmem>>, vector<16x128xbf16>,
    %c8 = arith.constant 8 : index
    %c0_26 = arith.constant 0 : index
    %42 = vector.load %arg10[%c8, %c0_26] : memref<32x128xf32, #tpu.memory_space<vmem>>, vector<16x128xf32>
    %43 = arith.truncf %42 : vector<16x128xf32> to vector<16x128xbf16>
    %c0_27 = arith.constant 0 : index
    %c512 = arith.constant 512 : index
    %44 = vector.load %arg13[%c0_27, %c512] : memref<16x1152xbf16, #tpu.memory_space<vmem>>, vector<16x128xbf16>
    tpu.vector_store %arg13[%c0_27, %c512], %43 {strides = array<i32>} : memref<16x1152xbf16, #tpu.memory_space<vmem>>, vector<16x128xbf16>,
    %c9 = arith.constant 9 : index
    %c0_28 = arith.constant 0 : index
    %45 = vector.load %arg10[%c9, %c0_28] : memref<32x128xf32, #tpu.memory_space<vmem>>, vector<16x128xf32>
    %46 = arith.truncf %45 : vector<16x128xf32> to vector<16x128xbf16>
    %c0_29 = arith.constant 0 : index
    %c640 = arith.constant 640 : index
    %47 = vector.load %arg13[%c0_29, %c640] : memref<16x1152xbf16, #tpu.memory_space<vmem>>, vector<16x128xbf16>
    tpu.vector_store %arg13[%c0_29, %c640], %46 {strides = array<i32>} : memref<16x1152xbf16, #tpu.memory_space<vmem>>, vector<16x128xbf16>,
    %c10 = arith.constant 10 : index
    %c0_30 = arith.constant 0 : index
    %48 = vector.load %arg10[%c10, %c0_30] : memref<32x128xf32, #tpu.memory_space<vmem>>, vector<16x128xf32>
    %49 = arith.truncf %48 : vector<16x128xf32> to vector<16x128xbf16>
    %c0_31 = arith.constant 0 : index
    %c768 = arith.constant 768 : index
    %50 = vector.load %arg13[%c0_31, %c768] : memref<16x1152xbf16, #tpu.memory_space<vmem>>, vector<16x128xbf16>
    tpu.vector_store %arg13[%c0_31, %c768], %49 {strides = array<i32>} : memref<16x1152xbf16, #tpu.memory_space<vmem>>, vector<16x128xbf16>,
    %c11 = arith.constant 11 : index
    %c0_32 = arith.constant 0 : index
    %51 = vector.load %arg10[%c11, %c0_32] : memref<32x128xf32, #tpu.memory_space<vmem>>, vector<16x128xf32>
    %52 = arith.truncf %51 : vector<16x128xf32> to vector<16x128xbf16>
    %c0_33 = arith.constant 0 : index
    %c896 = arith.constant 896 : index
    %53 = vector.load %arg13[%c0_33, %c896] : memref<16x1152xbf16, #tpu.memory_space<vmem>>, vector<16x128xbf16>
    tpu.vector_store %arg13[%c0_33, %c896], %52 {strides = array<i32>} : memref<16x1152xbf16, #tpu.memory_space<vmem>>, vector<16x128xbf16>,
    %c12 = arith.constant 12 : index
    %c0_34 = arith.constant 0 : index
    %54 = vector.load %arg10[%c12, %c0_34] : memref<32x128xf32, #tpu.memory_space<vmem>>, vector<16x128xf32>
    %55 = arith.truncf %54 : vector<16x128xf32> to vector<16x128xbf16>
    %c0_35 = arith.constant 0 : index
    %c1024 = arith.constant 1024 : index
    %56 = vector.load %arg13[%c0_35, %c1024] : memref<16x1152xbf16, #tpu.memory_space<vmem>>, vector<16x128xbf16>
    tpu.vector_store %arg13[%c0_35, %c1024], %55 {strides = array<i32>} : memref<16x1152xbf16, #tpu.memory_space<vmem>>, vector<16x128xbf16>,
    %c0_36 = arith.constant 0 : index
    %c0_37 = arith.constant 0 : index
    %57 = vector.load %arg13[%c0_36, %c0_37] : memref<16x1152xbf16, #tpu.memory_space<vmem>>, vector<16x1152xbf16>
    %c0_38 = arith.constant 0 : index
    %c0_39 = arith.constant 0 : index
    %58 = vector.load %arg3[%c0_38, %c0_39] : memref<1152x128xbf16, #tpu.memory_space<vmem>>, vector<1152x128xbf16>
    %cst = arith.constant dense<0.000000e+00> : vector<16x128xf32>
    %59 = tpu.matmul %57, %58, %cst {dimension_numbers = #tpu.dot_dimension_numbers<[1], [0], [0], [1], [0, 0, 1, 1], [], []>} : vector<16x1152xbf16>, vector<1152x128xbf16>, vector<16x128xf32> -> vector<16x128xf32>
    %c0_40 = arith.constant 0 : index
    %c0_41 = arith.constant 0 : index
    %60 = vector.load %arg4[%c0_40, %c0_41] : memref<1x128xf32, #tpu.memory_space<vmem>>, vector<1x128xf32>
    %61 = vector.broadcast %60 : vector<1x128xf32> to vector<16x128xf32>
    %62 = arith.addf %59, %61 : vector<16x128xf32>
    %cst_42 = arith.constant 0.000000e+00 : f32
    %63 = vector.broadcast %cst_42 : f32 to vector<16x128xf32>
    %64 = arith.maximumf %62, %63 : vector<16x128xf32>
    %65 = arith.truncf %64 : vector<16x128xf32> to vector<16x128xbf16>
    %c0_43 = arith.constant 0 : index
    %c0_44 = arith.constant 0 : index
    %66 = vector.load %arg11[%c0_43, %c0_44] : memref<16x128xbf16, #tpu.memory_space<vmem>>, vector<16x128xbf16>
    tpu.vector_store %arg11[%c0_43, %c0_44], %65 {strides = array<i32>} : memref<16x128xbf16, #tpu.memory_space<vmem>>, vector<16x128xbf16>,
    %cst_45 = arith.constant 0.000000e+00 : f32
    %67 = vector.broadcast %cst_45 : f32 to vector<16x128xf32>
    %c0_46 = arith.constant 0 : index
    %c0_47 = arith.constant 0 : index
    %68 = vector.load %arg11[%c0_46, %c0_47] : memref<16x128xbf16, #tpu.memory_space<vmem>>, vector<16x128xbf16>
    %c0_48 = arith.constant 0 : index
    %c0_49 = arith.constant 0 : index
    %69 = vector.load %arg5[%c0_48, %c0_49] : memref<128x128xbf16, #tpu.memory_space<vmem>>, vector<128x128xbf16>
    %cst_50 = arith.constant dense<0.000000e+00> : vector<16x128xf32>
    %70 = tpu.matmul %68, %69, %cst_50 {dimension_numbers = #tpu.dot_dimension_numbers<[1], [0], [0], [1], [0, 0, 1, 1], [], []>} : vector<16x128xbf16>, vector<128x128xbf16>, vector<16x128xf32> -> vector<16x128xf32>
    %71 = arith.addf %67, %70 : vector<16x128xf32>
    %c0_51 = arith.constant 0 : index
    %c0_52 = arith.constant 0 : index
    %72 = vector.load %arg6[%c0_51, %c0_52] : memref<1x128xf32, #tpu.memory_space<vmem>>, vector<1x128xf32>
    %73 = vector.broadcast %72 : vector<1x128xf32> to vector<16x128xf32>
    %74 = arith.addf %71, %73 : vector<16x128xf32>
    %c8_53 = arith.constant 8 : index
    %c0_54 = arith.constant 0 : index
    %75 = vector.load %arg10[%c8_53, %c0_54] : memref<32x128xf32, #tpu.memory_space<vmem>>, vector<16x128xf32>
    %76 = arith.addf %74, %75 : vector<16x128xf32>
    %cst_55 = arith.constant dense<0.000000e+00> : vector<16xf32>
    %77 = vector.multi_reduction <add>, %76, %cst_55 [1] : vector<16x128xf32> to vector<16xf32>
    %78 = vector.shape_cast %77 : vector<16xf32> to vector<16x1xf32>
    %cst_56 = arith.constant 3.125000e-02 : f32
    %79 = vector.broadcast %cst_56 : f32 to vector<16x1xf32>
    %80 = arith.mulf %78, %79 : vector<16x1xf32>
    %81 = arith.mulf %76, %76 : vector<16x128xf32>
    %cst_57 = arith.constant dense<0.000000e+00> : vector<16xf32>
    %82 = vector.multi_reduction <add>, %81, %cst_57 [1] : vector<16x128xf32> to vector<16xf32>
    %83 = vector.shape_cast %82 : vector<16xf32> to vector<16x1xf32>
    %cst_58 = arith.constant 3.125000e-02 : f32
    %84 = vector.broadcast %cst_58 : f32 to vector<16x1xf32>
    %85 = arith.mulf %83, %84 : vector<16x1xf32>
    %86 = arith.mulf %80, %80 : vector<16x1xf32>
    %87 = arith.subf %85, %86 : vector<16x1xf32>
    %88 = vector.broadcast %80 : vector<16x1xf32> to vector<16x128xf32>
    %89 = arith.subf %76, %88 : vector<16x128xf32>
    %cst_59 = arith.constant 9.99999974E-6 : f32
    %90 = vector.broadcast %cst_59 : f32 to vector<16x1xf32>
    %91 = arith.addf %87, %90 : vector<16x1xf32>
    %92 = math.rsqrt %91 : vector<16x1xf32>
    %93 = vector.broadcast %92 : vector<16x1xf32> to vector<16x128xf32>
    %94 = arith.mulf %89, %93 : vector<16x128xf32>
    %c0_60 = arith.constant 0 : index
    %c0_61 = arith.constant 0 : index
    %95 = vector.load %arg7[%c0_60, %c0_61] : memref<1x128xf32, #tpu.memory_space<vmem>>, vector<1x128xf32>
    %96 = vector.broadcast %95 : vector<1x128xf32> to vector<16x128xf32>
    %97 = arith.mulf %94, %96 : vector<16x128xf32>
    %c0_62 = arith.constant 0 : index
    %c0_63 = arith.constant 0 : index
    %98 = vector.load %arg8[%c0_62, %c0_63] : memref<1x128xf32, #tpu.memory_space<vmem>>, vector<1x128xf32>
    %99 = vector.broadcast %98 : vector<1x128xf32> to vector<16x128xf32>
    %100 = arith.addf %97, %99 : vector<16x128xf32>
    %c0_64 = arith.constant 0 : index
    %c0_65 = arith.constant 0 : index
    %c0_66 = arith.constant 0 : index
    %101 = vector.load %arg9[%c0_64, %c0_65, %c0_66] : memref<1x16x128xf32, #tpu.memory_space<vmem>>, vector<1x16x128xf32>
    %102 = vector.shape_cast %101 : vector<1x16x128xf32> to vector<16x128xf32>
    %103 = vector.shape_cast %100 : vector<16x128xf32> to vector<1x16x128xf32>
    tpu.vector_store %arg9[%c0_64, %c0_65, %c0_66], %103 {strides = array<i32>} : memref<1x16x128xf32, #tpu.memory_space<vmem>>, vector<1x16x128xf32>,
    return
  }
  func.func @transform_1(%arg0: i32, %arg1: i32) -> (i32, i32) {
    %c0_i32 = arith.constant 0 : i32
    %c0_i32_0 = arith.constant 0 : i32
    %c0_i32_1 = arith.constant 0 : i32
    return %c0_i32, %c0_i32_0 : i32, i32
  }
  func.func @transform_2(%arg0: i32, %arg1: i32) -> (i32, i32) {
    %c0_i32 = arith.constant 0 : i32
    %c0_i32_0 = arith.constant 0 : i32
    %c0_i32_1 = arith.constant 0 : i32
    return %c0_i32, %c0_i32_0 : i32, i32
  }
  func.func @transform_3(%arg0: i32, %arg1: i32) -> (i32, i32) {
    %c0_i32 = arith.constant 0 : i32
    %c0_i32_0 = arith.constant 0 : i32
    %c0_i32_1 = arith.constant 0 : i32
    return %c0_i32, %c0_i32_0 : i32, i32
  }
  func.func @transform_4(%arg0: i32, %arg1: i32) -> (i32, i32) {
    %c0_i32 = arith.constant 0 : i32
    %c0_i32_0 = arith.constant 0 : i32
    %c0_i32_1 = arith.constant 0 : i32
    return %c0_i32, %c0_i32_0 : i32, i32
  }
  func.func @transform_5(%arg0: i32, %arg1: i32) -> (i32, i32) {
    %c0_i32 = arith.constant 0 : i32
    %c0_i32_0 = arith.constant 0 : i32
    %c0_i32_1 = arith.constant 0 : i32
    return %c0_i32, %c0_i32_0 : i32, i32
  }
  func.func @transform_6(%arg0: i32, %arg1: i32) -> (i32, i32) {
    %c0_i32 = arith.constant 0 : i32
    %c0_i32_0 = arith.constant 0 : i32
    %c0_i32_1 = arith.constant 0 : i32
    return %c0_i32, %c0_i32_0 : i32, i32
  }
  func.func @transform_7(%arg0: i32, %arg1: i32) -> (i32, i32, i32) {
    %c0_i32 = arith.constant 0 : i32
    %c0_i32_0 = arith.constant 0 : i32
    return %arg0, %arg1, %c0_i32 : i32, i32, i32
  }
}

</mosaic_0001>

<bundles_post_ra>
// kernel: tpu_custom_call.1
= control target key start
LH: loop header
LB: loop body
LE: loop exit
PB: predicated region body
PF: predicated region fallthrough
CT: control target
= control target key end

     0   :  { %s2602_s0 = inlined_call_operand.hbm [shape: f32[2,48,128], index: 0, kind: input, shape index: {}]   ;;  %s2603_s1 = inlined_call_operand.hbm [shape: bf16[1152,128], index: 1, kind: input, shape index: {}]   ;;  %s2604_s2 = inlined_call_operand.vmem [shape: f32[1,128], index: 2, kind: input, shape index: {}]   ;;  %s2605_s3 = inlined_call_operand.hbm [shape: bf16[128,128], index: 3, kind: input, shape index: {}]   ;;  %s2606_s4 = inlined_call_operand.vmem [shape: f32[1,128], index: 4, kind: input, shape index: {}]   ;;  %s2607_s5 = inlined_call_operand.vmem [shape: f32[1,128], index: 5, kind: input, shape index: {}]   ;;  %s2608_s6 = inlined_call_operand.vmem [shape: f32[1,128], index: 6, kind: input, shape index: {}]   ;;  %s2609_s7 = inlined_call_operand.hbm [shape: f32[2,48,128], index: 7, kind: output, shape index: {}]  }
   0x1   :  { %2622 = sst [smem:[#allocation33_spill]] %s2603_s1 }
   0x2   :  { %2623 = sst [smem:[#allocation34_spill]] %s2605_s3 }
   0x3   :  { %12 = vsyncpa [#allocation7], 0 }
   0x4   :  { %13 = vsyncpa [#allocation10], 0 }
   0x5   :  { %14 = vsyncpa [#allocation8], 0 }
   0x6   :  { %16 = vsyncpa [#allocation8 + $0x1], 0  ;;  %s2266_s24 = smov 0   ;;  %s2268_s25 = smov 0  }
   0x7   :  { %s2270_s26 = smov 0   ;;  %s2272_s27 = smov 0  }
   0x8   :  { %s2274_s28 = smov 0   ;;  %s2276_s29 = smov 0  }
   0x9   :  { %s2278_s30 = smov 0   ;;  %s2280_s8 = smov 0  }
   0xa LB: > { %2624 = sst [smem:[#allocation26_spill]] %s2189_s26  ;;  %s1501_s9 = sadd.s32 4294967295, %s2209_s8   ;;  %s2209_s8 = sphi %s2280_s8, %s22_s8   ;;  %s2205_s30 = sphi %s2278_s30, %s2651_s30   ;;  %s2201_s29 = sphi %s2276_s29, %s2650_s29   ;;  %s2197_s28 = sphi %s2274_s28, %s2649_s28   ;;  %s2193_s27 = sphi %s2272_s27, %s2648_s27   ;;  %s2189_s26 = sphi %s2270_s26, %s2647_s26   ;;  %s2185_s25 = sphi %s2268_s25, %s2653_s25   ;;  %s2181_s24 = sphi %s2266_s24, %s2652_s24  }
   0xb   : > { %2625 = sst [smem:[#allocation27_spill]] %s2201_s29  ;;  %s1502_s10 = sadd.s32 4294967294, %s2209_s8  }
   0xc   : > { %2626 = sst [smem:[#allocation28_spill]] %s2205_s30  ;;  %s31_s11 = sadd.s32 1, %s2201_s29 }
   0xd   : > { %s34_s12 = sadd.s32 1, %s2205_s30  ;;  %p32_p0 = scmp.ge.s32.totalorder %s31_s11, 3 }
   0xe   : > { %s169_s13 = sadd.s32 1, %s2189_s26  ;;  %p179_p1 = scmp.ne.s32.totalorder %s2189_s26, %s2185_s25 }
   0xf   : > { %p180_p2 = scmp.eq.s32.totalorder %s1501_s9, 5  ;;  %s2655_s11 = smov (%p32_p0, %s31_s11), 0 }
  0x10   : > { %2627 = sst [smem:[#allocation29_spill]] %s2655_s11  ;;  %s2657_s12 = smov (!%p32_p0, %s34_s12), %s2205_s30 }
  0x11   : > { %s165_s14 = ssub.s32 %s2201_s29, %s2655_s11  ;;  %p2318_p3 = por %p180_p2, %p179_p1 }
  0x12   : > { %p36_p4 = scmp.ge.s32.totalorder %s2657_s12, 2  ;;  %p185_p5 = scmp.ne.s32.totalorder %s2185_s25, %s2181_s24 }
  0x13   : > { %s2628_s15 = scalar_select %p2318_p3, 1, 0 }
  0x14   : > { %p186_p6 = scmp.eq.s32.totalorder %s1502_s10, 5  ;;  %p1503_p7 = scmp.ge.s32.totalorder %s2209_s8, 1 }
  0x15   : > { %s2659_s12 = smov (%p36_p4, %s2657_s12), 0  ;;  %p193_p9 = scmp.lt.s32.totalorder %s2209_s8, 7 }
  0x16   : > { %2629 = sst [smem:[#allocation30_spill]] %s2659_s12  ;;  %p2327_p8 = por %p186_p6, %p185_p5 }
  0x17   : > { %s164_s17 = ssub.s32 %s2205_s30, %s2659_s12  ;;  %p2334_p10 = pnand %p1503_p7, %p193_p9 }
  0x18   : > { %s2630_s16 = scalar_select %p2327_p8, 1, 0 }
  0x19   : > { %s166_s18 = sor.u32 %s165_s14, %s164_s17  ;;  %p2338_p12 = scmp.eq.s32.totalorder %s1501_s9, 0 }
  0x1a   : > { %2631 = sst [smem:[#allocation31_spill]] %s2630_s16  ;;  %p167_p11 = scmp.eq.s32.totalorder %s166_s18, 0 }
  0x1b   : > { %s2632_s19 = scalar_select %p2334_p10, 1, 0 }
  0x1c   : > { %s2633_s20 = scalar_select %p2338_p12, 1, 0 }
  0x1d   : > { %p1779_p13 = pneg %p2334_p10  ;;  %s2211_s22 = smov [#allocation6]  }
  0x1e   : > { %s2345_s21 = scalar_select %p167_p11, %s2189_s26, %s169_s13  }
  0x1f   : > { %s205_s23 = sshll.u32 %s2211_s22, 4  ;;  %p2349_p0 = pnand %p2338_p12, %p1779_p13  ;;  %s206_s23 = int_to_ptr.vmem [resolvable:$true] %s205_s23 }
  0x20   : > { %2634 = sst [smem:[#allocation32_spill]] %s2345_s21  ;;  %s2636_s1 = sld [smem:[#allocation33_spill]] }
  0x21   : > { %p1962_p2 = pneg %p2349_p0 }
  0x26   : > { %s1960_s17 = scalar_lea.hbm %s2636_s1, 9216 }
  0x27   : > { %p1961_p1 = scmp.ne.s32.totalorder %s2636_s1, %s1960_s17  ;;  %p1967_p6 = scmp.lt.u32.totalorder %s1960_s17, %s2636_s1 }
  0x29   : > { %p1963_p4 = pnand %p1962_p2, %p1961_p1 }
  0x2b   : > { %p1964_p5 = pneg %p1963_p4 }
  0x2d   : > { %p1969_p7 = pnand %p1967_p6, %p1964_p5 }
  0x2f   : > { %1972 = shalt.err (!%p1969_p7)
}
  0x30   : > { %s1973_s11 = scalar_lea.vmem %s206_s23, 9216  ;;  %p1981_p8 = scmp.lt.s32.totalorder %s206_s23, %s206_s23 }
  0x31   : > { %p1974_p9 = scmp.ne.s32.totalorder %s206_s23, %s1973_s11  ;;  %p1982_p3 = scmp.lt.s32.totalorder %s1973_s11, %s1973_s11 }
  0x33   : > { %p1976_p11 = pnand %p1974_p9, %p1962_p2  ;;  %p1983_p12 = por %p1982_p3, %p1981_p8 }
  0x35   : > { %p1977_p13 = pneg %p1976_p11 }
  0x37   : > { %p1984_p10 = pnand %p1983_p12, %p1977_p13 }
  0x39   : > { %1987 = shalt.err (!%p1984_p10)
}
  0x3a   : > { %s2212_s12 = smov 64   ;;  %s2213_s14 = smov 4  }
  0x3b   : > { %1782 = dma.hbm_to_vmem [thread:$0]  (!%p2349_p0), %s2636_s1, 9216, %s206_s23, [#allocation7], %s2212_s12, %s2212_s12, %s2213_s14  }
  0x3c   : > { %s2214_s18 = smov [#allocation9]   ;;  %s2637_s3 = sld [smem:[#allocation34_spill]] }
  0x3d   : > { %s221_s13 = sshll.u32 %s2214_s18, 4  ;;  %s222_s13 = int_to_ptr.vmem [resolvable:$true] %s221_s13 }
  0x42   : > { %s1988_s29 = scalar_lea.hbm %s2637_s3, 1024 }
  0x43   : > { %p1989_p3 = scmp.ne.s32.totalorder %s2637_s3, %s1988_s29  ;;  %p1995_p12 = scmp.lt.u32.totalorder %s1988_s29, %s2637_s3 }
  0x45   : > { %p1991_p8 = pnand %p1989_p3, %p1962_p2 }
  0x47   : > { %p1992_p10 = pneg %p1991_p8 }
  0x49   : > { %p1997_p1 = pnand %p1995_p12, %p1992_p10 }
  0x4b   : > { %2000 = shalt.err (!%p1997_p1)
}
  0x4c   : > { %s2001_s23 = scalar_lea.vmem %s222_s13, 1024  ;;  %p2009_p7 = scmp.lt.s32.totalorder %s222_s13, %s222_s13 }
  0x4d   : > { %p2002_p4 = scmp.ne.s32.totalorder %s222_s13, %s2001_s23  ;;  %p2010_p9 = scmp.lt.s32.totalorder %s2001_s23, %s2001_s23 }
  0x4f   : > { %p2004_p5 = pnand %p2002_p4, %p1962_p2  ;;  %p2011_p11 = por %p2010_p9, %p2009_p7 }
  0x51   : > { %p2005_p6 = pneg %p2004_p5 }
  0x53   : > { %p2012_p13 = pnand %p2011_p11, %p2005_p6 }
  0x55   : > { %2015 = shalt.err (!%p2012_p13)
}
  0x56   : > { %1785 = dma.hbm_to_vmem [thread:$0]  (!%p2349_p0), %s2637_s3, 1024, %s222_s13, [#allocation10], %s2212_s12, %s2212_s12, %s2213_s14  }
  0x57   : > { %p2638_p3 = scmp.ne.s32.totalorder %s2632_s19, 0 }
  0x58   : > { %p2639_p8 = scmp.ne.s32.totalorder (!%p2638_p3), %s2633_s20, 0 }
  0x59   : > { %246 = sbr.rel (%p2638_p3) target bundleno = 917 (0x395), region = 44 }
  0x60   : > { %2158 = dma.done.wait (%p2639_p8), [#allocation7], 9216  }
  0x61   : > { %2160 = vsyncadd (%p2639_p8), [#allocation7], 4294958080 }
  0x62   : > { %2162 = dma.done.wait (%p2639_p8), [#allocation10], 1024  }
  0x63   : > { %2164 = vsyncadd (%p2639_p8), [#allocation10], 4294966272  ;;  %s2620_s26 = sand.u32 1, %s2185_s25   ;;  %s1510_s29 = sshll.u32 %s2193_s27, 4 }
  0x64   : > { %s2409_s16 = sshll.u32 %s2620_s26, 4  ;;  %s278_s19 = smul.u32 48, %s2197_s28 }
  0x65   : > { %s2215_s12 = smov [#allocation2 + $0x8]   ;;  %s1513_s13 = sadd.s32 4294967292, %s1510_s29 }
  0x66   : > { %s279_s10 = sadd.s32 %s1510_s29, %s278_s19  ;;  %s290_s14 = sshll.u32 %s2215_s12, 4  ;;  %s291_s14 = int_to_ptr.vmem [resolvable:$true] %s290_s14 }
  0x67   : > { %s1511_s9 = sshll.u32 %s279_s10, 4  ;;  %s2427_s30 = scalar_lea.hbm %s2602_s0, 1536 }
  0x68   : > { %s2417_s18 = scalar_lea.hbm %s2602_s0, %s1511_s9 }
  0x69   : > { %s2420_s22 = scalar_lea.hbm %s2417_s18, 256  ;;  %p2019_p2 = scmp.lt.u32.totalorder %s2417_s18, %s2602_s0 }
  0x6a   : > { %p2017_p0 = scmp.ne.s32.totalorder %s2417_s18, %s2420_s22  ;;  %p2020_p10 = scmp.lt.u32.totalorder %s2427_s30, %s2420_s22 }
  0x6b   : > { %p2022_p1 = scmp.lt.u32.totalorder %s2420_s22, %s2417_s18 }
  0x6c   : > { %p2021_p12 = por %p2020_p10, %p2019_p2 }
  0x6e   : > { %p2023_p4 = por %p2022_p1, %p2021_p12 }
  0x70   : > { %p2024_p5 = pnand %p2023_p4, %p2017_p0 }
  0x72   : > { %2027 = shalt.err (!%p2024_p5)  }
  0x73   : > { %s2028_s29 = scalar_lea.vmem %s291_s14, 256  ;;  %s2216_s12 = smov [#allocation2]  }
  0x74   : > { %p2029_p6 = scmp.ne.s32.totalorder %s291_s14, %s2028_s29  ;;  %s2030_s9 = sshll.u32 %s2216_s12, 4  ;;  %s2437_s9 = int_to_ptr.vmem [resolvable:$false] %s2030_s9 }
  0x75   : > { %s2440_s17 = scalar_lea.vmem %s2437_s9, 512  ;;  %p2033_p7 = scmp.lt.s32.totalorder %s291_s14, %s2437_s9 }
  0x76   : > { %p2034_p9 = scmp.lt.s32.totalorder %s2440_s17, %s2028_s29 }
  0x78   : > { %p2035_p11 = por %p2034_p9, %p2033_p7 }
  0x7a   : > { %p2036_p13 = pnand %p2035_p11, %p2029_p6 }
  0x7c   : > { %2039 = shalt.err (!%p2036_p13)  }
  0x7d   : > { %293 = dma.hbm_to_vmem [thread:$0]  %s2417_s18, 256, %s291_s14, [#allocation4] }
  0x7e   : > { %s299_s20 = sadd.s32 %s1513_s13, %s278_s19  ;;  %p2621_p3 = scmp.gt.s32.totalorder %s2193_s27, 0 }
  0x7f   : > { %s1514_s11 = sshll.u32 %s299_s20, 4  ;;  %s2217_s12 = smov [#allocation2 + $0x4]  }
  0x80   : > { %s301_s10 = scalar_lea.hbm %s2602_s0, %s1514_s11  ;;  %s311_s26 = sshll.u32 %s2217_s12, 4  ;;  %s312_s26 = int_to_ptr.vmem [resolvable:$true] %s311_s26 }
  0x81   : > { %s2040_s29 = scalar_lea.hbm %s301_s10, 64  ;;  %p2045_p10 = scmp.lt.u32.totalorder %s301_s10, %s2602_s0 }
  0x82   : > { %p2041_p8 = scmp.ne.s32.totalorder %s301_s10, %s2040_s29  ;;  %p2046_p12 = scmp.lt.u32.totalorder %s2427_s30, %s2040_s29 }
  0x83   : > { %p2048_p4 = scmp.lt.u32.totalorder %s2040_s29, %s301_s10 }
  0x84   : > { %p2042_p0 = pnand %p2041_p8, %p2621_p3  ;;  %p2047_p1 = por %p2046_p12, %p2045_p10 }
  0x86   : > { %p2043_p2 = pneg %p2042_p0  ;;  %p2049_p5 = por %p2048_p4, %p2047_p1 }
  0x88   : > { %p2050_p6 = pnand %p2049_p5, %p2043_p2 }
  0x8a   : > { %2053 = shalt.err (!%p2050_p6)  }
  0x8b   : > { %s2054_s19 = scalar_lea.vmem %s312_s26, 64  ;;  %p2061_p13 = scmp.lt.s32.totalorder %s312_s26, %s2437_s9 }
  0x8c   : > { %p2055_p7 = scmp.ne.s32.totalorder %s312_s26, %s2054_s19  ;;  %p2062_p8 = scmp.lt.s32.totalorder %s2440_s17, %s2054_s19 }
  0x8e   : > { %p2056_p9 = pnand %p2055_p7, %p2621_p3  ;;  %p2063_p0 = por %p2062_p8, %p2061_p13 }
  0x90   : > { %p2057_p11 = pneg %p2056_p9 }
  0x92   : > { %p2064_p10 = pnand %p2063_p0, %p2057_p11 }
  0x94   : > { %2067 = shalt.err (!%p2064_p10)  }
  0x95   : > { %1770 = dma.hbm_to_vmem [thread:$0]  (%p2621_p3), %s301_s10, 64, %s312_s26, [#allocation4 + $0x1] }
  0x96   : > { %s2464_s1 = scalar_lea.vmem [#allocation11], %s2409_s16  ;;  %p1515_p2 = scmp.ne.s32.totalorder %s2193_s27, 0 }
  0x97   : > { %v2218_v0 = vmov (!%p1515_p2), 0.0  }
  0x98   : > { %318 = sbr.rel (%p1515_p2) target bundleno = 159 (0x9f), region = 68  ;;  %319 = vst [vmem:[#allocation2] sm:$0xff] (!%p1515_p2), %v2218_v0 }
  0x9f PF: > { %p1795_p12 = scmp.lt.s32.totalorder %s2193_s27, 2  ;;  %s2219_s3 = smov [#allocation2 + $0x18]  }
  0xa0   : > { %s338_s14 = sshll.u32 %s2219_s3, 4  ;;  %s2096_s26 = scalar_lea.hbm %s2417_s18, 320  ;;  %s339_s14 = int_to_ptr.vmem [resolvable:$true] %s338_s14 }
  0xa1   : > { %p2069_p1 = scmp.ne.s32.totalorder %s2420_s22, %s2096_s26  ;;  %p2073_p6 = scmp.lt.u32.totalorder %s2420_s22, %s2602_s0 }
  0xa2   : > { %p2074_p7 = scmp.lt.u32.totalorder %s2427_s30, %s2096_s26  ;;  %p2076_p11 = scmp.lt.u32.totalorder %s2096_s26, %s2420_s22 }
  0xa3   : > { %p2070_p4 = pnand %p2069_p1, %p1795_p12 }
  0xa4   : > { %p2075_p9 = por %p2074_p7, %p2073_p6 }
  0xa5   : > { %p2071_p5 = pneg %p2070_p4 }
  0xa6   : > { %p2077_p13 = por %p2076_p11, %p2075_p9 }
  0xa8   : > { %p2078_p8 = pnand %p2077_p13, %p2071_p5 }
  0xaa   : > { %2081 = shalt.err (!%p2078_p8)  }
  0xab   : > { %s2082_s20 = scalar_lea.vmem %s339_s14, 64  ;;  %p2089_p1 = scmp.lt.s32.totalorder %s339_s14, %s2437_s9 }
  0xac   : > { %p2083_p0 = scmp.ne.s32.totalorder %s339_s14, %s2082_s20  ;;  %p2090_p4 = scmp.lt.s32.totalorder %s2440_s17, %s2082_s20 }
  0xae   : > { %p2084_p10 = pnand %p2083_p0, %p1795_p12  ;;  %p2091_p3 = por %p2090_p4, %p2089_p1 }
  0xb0   : > { %p2085_p2 = pneg %p2084_p10 }
  0xb2   : > { %p2092_p6 = pnand %p2091_p3, %p2085_p2 }
  0xb4   : > { %2095 = shalt.err (!%p2092_p6)  }
  0xb5   : > { %1772 = dma.hbm_to_vmem [thread:$0]  (%p1795_p12), %s2420_s22, 64, %s339_s14, [#allocation4 + $0x2] }
  0xb6   : > { %p1519_p5 = scmp.ne.s32.totalorder %s2193_s27, 2 }
  0xb7   : > { %v2220_v1 = vmov (!%p1519_p5), 0.0  }
  0xb8   : > { %345 = sbr.rel (%p1519_p5) target bundleno = 191 (0xbf), region = 80  ;;  %346 = vst [vmem:[#allocation2 + $0x18] sm:$0xff] (!%p1519_p5), %v2220_v1 }
  0xbf PF: > { %2165 = dma.done.wait [#allocation4], 256 }
  0xc0   : > { %2166 = vsyncadd [#allocation4], 4294967040  ;;  %p2640_p7 = scmp.gt.s32.totalorder %s2193_s27, 0 }
  0xc2   : > { %2168 = dma.done.wait (%p2640_p7), [#allocation4 + $0x1], 64  ;;  %p2641_p9 = pmov %p2640_p7 }
  0xc4   : > { %2170 = vsyncadd (%p2641_p9), [#allocation4 + $0x1], 4294967232 }
  0xc5   : > { %2172 = dma.done.wait (%p1795_p12), [#allocation4 + $0x2], 64 }
  0xc6   : > { %2174 = vsyncadd (%p1795_p12), [#allocation4 + $0x2], 4294967232  ;;  %v1876_v2 = vld [vmem:[#allocation6 + $0x40] sm:$0xff]   ;;  %v1880_v6 = vld [vmem:[#allocation6 + $0x48] sm:$0xff]   ;;  %vm2222_vm0 = vmmov 0   ;;  %s1760_s17 = smul.u32 6, %s2197_s28 }
  0xc7   : > { %v1877_v3 = vld [vmem:[#allocation6] sm:$0xff]   ;;  %1614 = vmatprep.subr.bf16.mxu0 %v1876_v2  ;;  %v1881_v7 = vld [vmem:[#allocation6 + $0x8] sm:$0xff]   ;;  %v1884_v10 = vld [vmem:[#allocation6 + $0x50] sm:$0xff]   ;;  %s1607_s11 = sshll.u32 %s2193_s27, 1  ;;  %s1380_s28 = sshll.u32 %s2464_s1, 4  ;;  %s2545_s28 = int_to_ptr.vmem [resolvable:$true] %s1380_s28 }
  0xc8   : > { %v1878_v4 = vld [vmem:[#allocation6 + $0xc0] sm:$0xff]   ;;  %1615 = vmatpush3.bf16.msra.mxu0 %v1877_v3  ;;  %v1882_v8 = vld [vmem:[#allocation6 + $0xc8] sm:$0xff]   ;;  %v1885_v11 = vld [vmem:[#allocation6 + $0x10] sm:$0xff]   ;;  %s1377_s29 = sadd.s32 %s1760_s17, %s1607_s11  ;;  %s2642_s26 = sand.u32 1, %s2185_s25  }
  0xc9   : > { %v1879_v5 = vld [vmem:[#allocation6 + $0x80] sm:$0xff]   ;;  %1636 = vmatprep.subr.bf16.mxu1 %v1878_v4  ;;  %1616 = vmatprep.subr.bf16.mxu0 %v1880_v6  ;;  %v1883_v9 = vld [vmem:[#allocation6 + $0x88] sm:$0xff]   ;;  %v1886_v12 = vld [vmem:[#allocation6 + $0xd0] sm:$0xff]   ;;  %s1608_s27 = sshll.u32 %s1377_s29, 7  ;;  %s2550_s16 = scalar_lea.sflag [#allocation8], %s2642_s26 }
  0xca   : > { %1637 = vmatpush3.bf16.msra.mxu1 %v1879_v5  ;;  %v1887_v13 = vld [vmem:[#allocation6 + $0x90] sm:$0xff]   ;;  %v1888_v14 = vld [vmem:[#allocation6 + $0x58] sm:$0xff]   ;;  %v1892_v18 = vld [vmem:[#allocation6 + $0x60] sm:$0xff]   ;;  %s2543_s14 = scalar_lea.hbm %s2609_s7, %s1608_s27  ;;  %s2097_s13 = scalar_lea.vmem %s2545_s28, 256 }
  0xcb   : > { %1638 = vmatprep.subr.bf16.mxu1 %v1882_v8  ;;  %v1889_v15 = vld [vmem:[#allocation6 + $0x18] sm:$0xff]   ;;  %v1893_v19 = vld [vmem:[#allocation6 + $0x20] sm:$0xff]   ;;  %v1896_v22 = vld [vmem:[#allocation6 + $0x68] sm:$0xff]   ;;  %p2098_p3 = scmp.ne.s32.totalorder %s2545_s28, %s2097_s13  ;;  %p2643_p12 = scmp.ne.s32.totalorder %s2628_s15, 0 }
  0xcc   : > { %1617 = vmatpush3.bf16.msra.mxu0 %v1881_v7  ;;  %v1890_v16 = vld [vmem:[#allocation6 + $0xd8] sm:$0xff]   ;;  %v1894_v20 = vld [vmem:[#allocation6 + $0xe0] sm:$0xff]   ;;  %v1897_v23 = vld [vmem:[#allocation6 + $0x28] sm:$0xff]   ;;  %s2223_s20 = smov [#allocation11]  }
  0xcd   : > { %1618 = vmatprep.subr.bf16.mxu0 %v1884_v10  ;;  %v1891_v17 = vld [vmem:[#allocation6 + $0x98] sm:$0xff]   ;;  %v1895_v21 = vld [vmem:[#allocation6 + $0xa0] sm:$0xff]   ;;  %v1898_v24 = vld [vmem:[#allocation6 + $0xe8] sm:$0xff]   ;;  %p2099_p11 = pnand %p2098_p3, %p2643_p12  ;;  %s2101_s18 = sshll.u32 %s2223_s20, 4  ;;  %s2102_s18 = int_to_ptr.vmem [resolvable:$false] %s2101_s18 }
  0xce   : > { %1639 = vmatpush3.bf16.msra.mxu1 %v1883_v9  ;;  %v1899_v25 = vld [vmem:[#allocation6 + $0xa8] sm:$0xff]   ;;  %v1900_v26 = vld [vmem:[#allocation6 + $0x70] sm:$0xff]   ;;  %v1904_v30 = vld [vmem:[#allocation6 + $0x78] sm:$0xff]   ;;  %s2103_s22 = scalar_lea.vmem %s2102_s18, 512  ;;  %p2104_p8 = scmp.lt.s32.totalorder %s2545_s28, %s2102_s18 }
  0xcf   : > { %1640 = vmatprep.subr.bf16.mxu1 %v1886_v12  ;;  %v1901_v27 = vld [vmem:[#allocation6 + $0x30] sm:$0xff]   ;;  %v1905_v31 = vld [vmem:[#allocation6 + $0x38] sm:$0xff]   ;;  %v368_v33 = vld [vmem:[#allocation2 + $0x5] sm:$0xff]  ;;  %p2100_p13 = pneg %p2099_p11  ;;  %p2105_p0 = scmp.lt.s32.totalorder %s2103_s22, %s2097_s13 }
  0xd0   : > { %1619 = vmatpush3.bf16.msra.mxu0 %v1885_v11  ;;  %v1902_v28 = vld [vmem:[#allocation6 + $0xf0] sm:$0xff]   ;;  %v1906_v32 = vld [vmem:[#allocation6 + $0xf8] sm:$0xff]   ;;  %v364_v37 = vld [vmem:[#allocation2 + $0x4] sm:$0xff] }
  0xd1   : > { %1620 = vmatprep.subr.bf16.mxu0 %v1888_v14  ;;  %v1903_v29 = vld [vmem:[#allocation6 + $0xb0] sm:$0xff]   ;;  %v1907_v36 = vld [vmem:[#allocation6 + $0xb8] sm:$0xff]   ;;  %v1908_v40 = vld [vmem:[#allocation6 + $0x140] sm:$0xff]   ;;  %p2106_p10 = por %p2105_p0, %p2104_p8 }
  0xd2   : > { %1641 = vmatpush3.bf16.msra.mxu1 %v1887_v13  ;;  %v369_v34 = vld [vmem:[#allocation2 + $0xd] sm:$0xff]  ;;  %v1909_v44 = vld [vmem:[#allocation6 + $0x100] sm:$0xff]   ;;  %v1920_v58 = vld [vmem:[#allocation6 + $0x158] sm:$0xff]  }
  0xd3   : > { %1642 = vmatprep.subr.bf16.mxu1 %v1890_v16  ;;  %v370_v35 = vpack.c.bf16 %v369_v34, %v368_v33  ;;  %v2494_v38 = vld [vmem:[#allocation2 + $0xc] sm:$0xff]  ;;  %v1910_v48 = vld [vmem:[#allocation6 + $0x1c0] sm:$0xff]   ;;  %v1921_v59 = vld [vmem:[#allocation6 + $0x118] sm:$0xff]   ;;  %p2107_p2 = pnand %p2106_p10, %p2100_p13 }
  0xd4   : > { %1621 = vmatpush3.bf16.msra.mxu0 %v1889_v15  ;;  %v366_v39 = vpack.c.bf16 %v2494_v38, %v364_v37  ;;  %v376_v41 = vld [vmem:[#allocation2 + $0x7] sm:$0xff]  ;;  %v377_v42 = vld [vmem:[#allocation2 + $0xf] sm:$0xff]  ;;  %v1922_v60 = vld [vmem:[#allocation6 + $0x1d8] sm:$0xff]  }
  0xd5   : > { %1622 = vmatprep.subr.bf16.mxu0 %v1892_v18  ;;  %1024 = vmatprep.mubr.bf16.mxu0 %v370_v35  ;;  %v378_v43 = vpack.c.bf16 %v377_v42, %v376_v41  ;;  %v372_v45 = vld [vmem:[#allocation2 + $0x6] sm:$0xff]  ;;  %v373_v46 = vld [vmem:[#allocation2 + $0xe] sm:$0xff]  ;;  %v1923_v61 = vld [vmem:[#allocation6 + $0x198] sm:$0xff]  }
  0xd6   : > { %1643 = vmatpush3.bf16.msra.mxu1 %v1891_v17  ;;  %v374_v47 = vpack.c.bf16 %v373_v46, %v372_v45  ;;  %v1911_v49 = vld [vmem:[#allocation6 + $0x180] sm:$0xff]   ;;  %v1912_v50 = vld [vmem:[#allocation6 + $0x148] sm:$0xff]   ;;  %v1916_v54 = vld [vmem:[#allocation6 + $0x150] sm:$0xff]  }
  0xd7   : > { %1644 = vmatprep.subr.bf16.mxu1 %v1894_v20  ;;  %1065 = vmatprep.mubr.bf16.mxu1 %v378_v43  ;;  %v1913_v51 = vld [vmem:[#allocation6 + $0x108] sm:$0xff]   ;;  %v1917_v55 = vld [vmem:[#allocation6 + $0x110] sm:$0xff]   ;;  %v1924_v62 = vld [vmem:[#allocation6 + $0x160] sm:$0xff]  }
  0xd8   : > { %1623 = vmatpush3.bf16.msra.mxu0 %v1893_v19  ;;  %v1914_v52 = vld [vmem:[#allocation6 + $0x1c8] sm:$0xff]   ;;  %v1918_v56 = vld [vmem:[#allocation6 + $0x1d0] sm:$0xff]   ;;  %v1925_v63 = vld [vmem:[#allocation6 + $0x120] sm:$0xff]   ;;  %v2221_v19 = vmov 0.0  }
  0xd9   : > { %1624 = vmatprep.subr.bf16.mxu0 %v1896_v22  ;;  %v1915_v53 = vld [vmem:[#allocation6 + $0x188] sm:$0xff]   ;;  %v1919_v57 = vld [vmem:[#allocation6 + $0x190] sm:$0xff]   ;;  %v1926_v0 = vld [vmem:[#allocation6 + $0x1e0] sm:$0xff]  }
  0xda   : > { %1645 = vmatpush3.bf16.msra.mxu1 %v1895_v21  ;;  %v1927_v1 = vld [vmem:[#allocation6 + $0x1a0] sm:$0xff]   ;;  %v1928_v2 = vld [vmem:[#allocation6 + $0x168] sm:$0xff]   ;;  %v1932_v6 = vld [vmem:[#allocation6 + $0x170] sm:$0xff]  }
  0xdb   : > { %1646 = vmatprep.subr.bf16.mxu1 %v1898_v24  ;;  %v1929_v3 = vld [vmem:[#allocation6 + $0x128] sm:$0xff]   ;;  %v1933_v7 = vld [vmem:[#allocation6 + $0x130] sm:$0xff]   ;;  %v1936_v10 = vld [vmem:[#allocation6 + $0x178] sm:$0xff]  }
  0xdc   : > { %1625 = vmatpush3.bf16.msra.mxu0 %v1897_v23  ;;  %v1930_v4 = vld [vmem:[#allocation6 + $0x1e8] sm:$0xff]   ;;  %v1934_v8 = vld [vmem:[#allocation6 + $0x1f0] sm:$0xff]   ;;  %v1937_v11 = vld [vmem:[#allocation6 + $0x138] sm:$0xff]  }
  0xdd   : > { %1626 = vmatprep.subr.bf16.mxu0 %v1900_v26  ;;  %v1931_v5 = vld [vmem:[#allocation6 + $0x1a8] sm:$0xff]   ;;  %v1935_v9 = vld [vmem:[#allocation6 + $0x1b0] sm:$0xff]   ;;  %v1938_v12 = vld [vmem:[#allocation6 + $0x1f8] sm:$0xff]  }
  0xde   : > { %1647 = vmatpush3.bf16.msra.mxu1 %v1899_v25  ;;  %v384_v13 = vld [vmem:[#allocation2 + $0x9] sm:$0xff]  ;;  %v385_v14 = vld [vmem:[#allocation2 + $0x11] sm:$0xff]  ;;  %v1940_v24 = vld [vmem:[#allocation6 + $0x200] sm:$0xff]  }
  0xdf   : > { %1648 = vmatprep.subr.bf16.mxu1 %v1902_v28  ;;  %v386_v15 = vpack.c.bf16 %v385_v14, %v384_v13  ;;  %v1939_v16 = vld [vmem:[#allocation6 + $0x1b8] sm:$0xff]   ;;  %v2497_v17 = vld [vmem:[#allocation2 + $0x8] sm:$0xff]  ;;  %v2499_v18 = vld [vmem:[#allocation2 + $0x10] sm:$0xff] }
  0xe0   : > { %1627 = vmatpush3.bf16.msra.mxu0 %v1901_v27  ;;  %v382_v20 = vpack.c.bf16 %v2499_v18, %v2497_v17  ;;  %v392_v21 = vld [vmem:[#allocation2 + $0xb] sm:$0xff]  ;;  %v393_v22 = vld [vmem:[#allocation2 + $0x13] sm:$0xff]  ;;  %v1948_v37 = vld [vmem:[#allocation9] sm:$0xff]  }
  0xe1   : > { %1628 = vmatprep.subr.bf16.mxu0 %v1904_v30  ;;  %v394_v23 = vpack.c.bf16 %v393_v22, %v392_v21  ;;  %v388_v25 = vld [vmem:[#allocation2 + $0xa] sm:$0xff]  ;;  %v389_v26 = vld [vmem:[#allocation2 + $0x12] sm:$0xff]  ;;  %v1952_v42 = vld [vmem:[#allocation9 + $0x20] sm:$0xff]  }
  0xe2   : > { %1649 = vmatpush3.bf16.msra.mxu1 %v1903_v29  ;;  %v390_v27 = vpack.c.bf16 %v389_v26, %v388_v25  ;;  %v1941_v28 = vld [vmem:[#allocation6 + $0x208] sm:$0xff]   ;;  %v1942_v29 = vld [vmem:[#allocation6 + $0x210] sm:$0xff]   ;;  %v1943_v30 = vld [vmem:[#allocation6 + $0x218] sm:$0xff]  }
  0xe3   : > { %1650 = vmatprep.subr.bf16.mxu1 %v1906_v32  ;;  %v1945_v32 = vld [vmem:[#allocation6 + $0x228] sm:$0xff]   ;;  %v1946_v33 = vld [vmem:[#allocation6 + $0x230] sm:$0xff]   ;;  %v1947_v34 = vld [vmem:[#allocation6 + $0x238] sm:$0xff]  }
  0xe4   : > { %1629 = vmatpush3.bf16.msra.mxu0 %v1905_v31  ;;  %v1944_v31 = vld [vmem:[#allocation6 + $0x220] sm:$0xff]   ;;  %v397_v35 = vld [vmem:[#allocation2 + $0x14] sm:$0xff] }
  0xe5   : > { %1658 = vmatprep.subr.bf16.mxu0 %v1908_v40  ;;  %v1950_v40 = vld [vmem:[#allocation9 + $0x10] sm:$0xff]   ;;  %v1951_v41 = vld [vmem:[#allocation9 + $0x18] sm:$0xff]   ;;  %v1522_v46 = vld [vmem:[%s2604_s2] ss:$0 sm:$0xff] }
  0xe6   : > { %1651 = vmatpush3.bf16.msra.mxu1 %v1907_v36  ;;  %v398_v36 = vpack.c.bf16 %v397_v35, %v2494_v38  ;;  %v1953_v38 = vld [vmem:[#allocation9 + $0x28] sm:$0xff]   ;;  %v1954_v43 = vld [vmem:[#allocation9 + $0x30] sm:$0xff]   ;;  %v1595_v25 = vld [vmem:[%s2606_s4] ss:$0 sm:$0xff] }
  0xe7   : > { %1025 = vmatmul.mubr.bf16.vlgmr.msra.gmra.mrb[0].mxu0 %v366_v39  ;;  %1680 = vmatprep.subr.bf16.mxu1 %v1910_v48  ;;  %v1949_v39 = vld [vmem:[#allocation9 + $0x8] sm:$0xff]  }
  0xe8   : > { %1659 = vmatpush3.bf16.msra.mxu0 %v1909_v44  ;;  %1106 = vmatprep.mubr.bf16.mxu0 %v386_v15  ;;  %v1955_v44 = vld [vmem:[#allocation9 + $0x38] sm:$0xff]  }
  0xe9   : > { %1066 = vmatmul.mubr.bf16.vlgmr.msra.gmra.mrb[0].mxu1 %v374_v47  ;;  %1660 = vmatprep.subr.bf16.mxu0 %v1912_v50 }
  0xea   : > { %1681 = vmatpush3.bf16.msra.mxu1 %v1911_v49  ;;  %1147 = vmatprep.mubr.bf16.mxu1 %v394_v23 }
  0xeb   : > { %1682 = vmatprep.subr.bf16.mxu1 %v1914_v52 }
  0xec   : > { %1661 = vmatpush3.bf16.msra.mxu0 %v1913_v51 }
  0xed   : > { %1662 = vmatprep.subr.bf16.mxu0 %v1916_v54 }
  0xee   : > { %1683 = vmatpush3.bf16.msra.mxu1 %v1915_v53 }
  0xef   : > { %1684 = vmatprep.subr.bf16.mxu1 %v1918_v56 }
  0xf0   : > { %1663 = vmatpush3.bf16.msra.mxu0 %v1917_v55 }
  0xf1   : > { %1664 = vmatprep.subr.bf16.mxu0 %v1920_v58 }
  0xf2   : > { %1685 = vmatpush3.bf16.msra.mxu1 %v1919_v57 }
  0xf3   : > { %1686 = vmatprep.subr.bf16.mxu1 %v1922_v60 }
  0xf4   : > { %1665 = vmatpush3.bf16.msra.mxu0 %v1921_v59 }
  0xf5   : > { %1666 = vmatprep.subr.bf16.mxu0 %v1924_v62 }
  0xf6   : > { %1687 = vmatpush3.bf16.msra.mxu1 %v1923_v61 }
  0xf7   : > { %1688 = vmatprep.subr.bf16.mxu1 %v1926_v0 }
  0xf8   : > { %1667 = vmatpush3.bf16.msra.mxu0 %v1925_v63 }
  0xf9   : > { %1668 = vmatprep.subr.bf16.mxu0 %v1928_v2 }
  0xfa   : > { %1689 = vmatpush3.bf16.msra.mxu1 %v1927_v1 }
  0xfb   : > { %1690 = vmatprep.subr.bf16.mxu1 %v1930_v4 }
  0xfc   : > { %1669 = vmatpush3.bf16.msra.mxu0 %v1929_v3 }
  0xfd   : > { %1670 = vmatprep.subr.bf16.mxu0 %v1932_v6 }
  0xfe   : > { %1691 = vmatpush3.bf16.msra.mxu1 %v1931_v5 }
  0xff   : > { %1692 = vmatprep.subr.bf16.mxu1 %v1934_v8 }
 0x100   : > { %1671 = vmatpush3.bf16.msra.mxu0 %v1933_v7 }
 0x101   : > { %1672 = vmatprep.subr.bf16.mxu0 %v1936_v10 }
 0x102   : > { %1693 = vmatpush3.bf16.msra.mxu1 %v1935_v9 }
 0x103   : > { %1694 = vmatprep.subr.bf16.mxu1 %v1938_v12 }
 0x104   : > { %1673 = vmatpush3.bf16.msra.mxu0 %v1937_v11 }
 0x105   : > { %1720 = vmatprep.subr.bf16.mxu0 %v2221_v19 }
 0x106   : > { %1695 = vmatpush3.bf16.msra.mxu1 %v1939_v16 }
 0x107   : > { %1107 = vmatmul.mubr.bf16.vlgmr.msra.gmra.mrb[4].mxu0 %v382_v20  ;;  %1740 = vmatprep.subr.bf16.mxu1 %v2221_v19 }
 0x108   : > { %1721 = vmatpush3.bf16.msra.mxu0 %v1940_v24  ;;  %1736 = vmatprep.mubr.msk.bf16.mxu0 %vm2222_vm0, %v2221_v19 }
 0x109   : > { %1722 = vmatprep.subr.bf16.mxu0 %v2221_v19  ;;  %1148 = vmatmul.mubr.bf16.vlgmr.msra.gmra.mrb[4].mxu1 %v390_v27 }
 0x10a   : > { %1756 = vmatprep.mubr.msk.bf16.mxu1 %vm2222_vm0, %v2221_v19  ;;  %1741 = vmatpush3.bf16.msra.mxu1 %v1948_v37 }
 0x10b   : > { %1742 = vmatprep.subr.bf16.mxu1 %v2221_v19 }
 0x10c   : > { %1723 = vmatpush3.bf16.msra.mxu0 %v1941_v28 }
 0x10d   : > { %1724 = vmatprep.subr.bf16.mxu0 %v2221_v19 }
 0x10e   : > { %1743 = vmatpush3.bf16.msra.mxu1 %v1949_v39 }
 0x10f   : > { %1744 = vmatprep.subr.bf16.mxu1 %v2221_v19 }
 0x110   : > { %1725 = vmatpush3.bf16.msra.mxu0 %v1942_v29 }
 0x111   : > { %1726 = vmatprep.subr.bf16.mxu0 %v2221_v19 }
 0x112   : > { %1745 = vmatpush3.bf16.msra.mxu1 %v1950_v40 }
 0x113   : > { %1746 = vmatprep.subr.bf16.mxu1 %v2221_v19 }
 0x114   : > { %1727 = vmatpush3.bf16.msra.mxu0 %v1943_v30 }
 0x115   : > { %1728 = vmatprep.subr.bf16.mxu0 %v2221_v19 }
 0x116   : > { %1747 = vmatpush3.bf16.msra.mxu1 %v1951_v41 }
 0x117   : > { %1748 = vmatprep.subr.bf16.mxu1 %v2221_v19 }
 0x118   : > { %1729 = vmatpush3.bf16.msra.mxu0 %v1944_v31 }
 0x119   : > { %1730 = vmatprep.subr.bf16.mxu0 %v2221_v19 }
 0x11a   : > { %1749 = vmatpush3.bf16.msra.mxu1 %v1952_v42 }
 0x11b   : > { %1750 = vmatprep.subr.bf16.mxu1 %v2221_v19 }
 0x11c   : > { %1731 = vmatpush3.bf16.msra.mxu0 %v1945_v32 }
 0x11d   : > { %1732 = vmatprep.subr.bf16.mxu0 %v2221_v19 }
 0x11e   : > { %1751 = vmatpush3.bf16.msra.mxu1 %v1953_v38 }
 0x11f   : > { %1752 = vmatprep.subr.bf16.mxu1 %v2221_v19 }
 0x120   : > { %1733 = vmatpush3.bf16.msra.mxu0 %v1946_v33 }
 0x121   : > { %1734 = vmatprep.subr.bf16.mxu0 %v2221_v19 }
 0x122   : > { %1753 = vmatpush3.bf16.msra.mxu1 %v1954_v43 }
 0x123   : > { %1754 = vmatprep.subr.bf16.mxu1 %v2221_v19 }
 0x124   : > { %1735 = vmatpush3.bf16.msra.mxu0 %v1947_v34 }
 0x126   : > { %1755 = vmatpush3.bf16.msra.mxu1 %v1955_v44 }
 0x127   : > { %1737 = vmatmul.mubr.bf16.vlgmr.msra.gmra.mrb[8].mxu0 %v398_v36 }
 0x1ba   : > { %v1630_v45 = vpop.f32.mrb[0].mxu0 }
 0x1bb   : > { %v1631_v47 = vpop.f32.mrb[1].mxu0 }
 0x1bc   : > { %v1632_v48 = vadd.f32 %v1631_v47, %v1630_v45  ;;  %v1633_v49 = vpop.f32.mrb[2].mxu0  ;;  %v1652_v50 = vpop.f32.mrb[0].mxu1 }
 0x1bd   : > { %v1634_v51 = vpop.f32.mrb[3].mxu0  ;;  %v1653_v54 = vpop.f32.mrb[1].mxu1 }
 0x1be   : > { %v1027_v52 = vadd.f32 %v1632_v48, %v1522_v46  ;;  %v1635_v53 = vadd.f32 %v1634_v51, %v1633_v49  ;;  %v1654_v55 = vadd.f32 %v1653_v54, %v1652_v50  ;;  %v1655_v56 = vpop.f32.mrb[2].mxu1  ;;  %v1604_v50 = vld [vmem:[%s2607_s5] ss:$0 sm:$0xff] }
 0x1bf   : > { %v1656_v58 = vpop.f32.mrb[3].mxu1 }
 0x1c0   : > { %v1030_v57 = vadd.f32 %v1635_v53, %v1522_v46  ;;  %v1068_v59 = vadd.f32 %v1654_v55, %v1027_v52  ;;  %v1657_v60 = vadd.f32 %v1656_v58, %v1655_v56  ;;  %v1605_v52 = vld [vmem:[%s2608_s6] ss:$0 sm:$0xff] }
 0x1c2   : > { %v1071_v61 = vadd.f32 %v1657_v60, %v1030_v57 }
 0x1da   : > { %v1674_v62 = vpop.f32.mrb[4].mxu0 }
 0x1db   : > { %v1675_v63 = vpop.f32.mrb[5].mxu0 }
 0x1dc   : > { %v1676_v0 = vadd.f32 %v1675_v63, %v1674_v62  ;;  %v1677_v1 = vpop.f32.mrb[6].mxu0  ;;  %v1696_v2 = vpop.f32.mrb[4].mxu1 }
 0x1dd   : > { %v1678_v3 = vpop.f32.mrb[7].mxu0  ;;  %v1697_v6 = vpop.f32.mrb[5].mxu1 }
 0x1de   : > { %v1109_v4 = vadd.f32 %v1676_v0, %v1068_v59  ;;  %v1679_v5 = vadd.f32 %v1678_v3, %v1677_v1  ;;  %v1698_v7 = vadd.f32 %v1697_v6, %v1696_v2  ;;  %v1699_v8 = vpop.f32.mrb[6].mxu1 }
 0x1df   : > { %v1700_v10 = vpop.f32.mrb[7].mxu1 }
 0x1e0   : > { %v1112_v9 = vadd.f32 %v1679_v5, %v1071_v61  ;;  %v1701_v11 = vadd.f32 %v1700_v10, %v1699_v8  ;;  %v1150_v12 = vadd.f32 %v1698_v7, %v1109_v4 }
 0x1e2   : > { %v1153_v13 = vadd.f32 %v1701_v11, %v1112_v9 }
 0x1fa   : > { %v1190_v14 = vpop.f32.mrb[8].mxu0 }
 0x1fb   : > { %v1191_v15 = vadd.f32 %v1190_v14, %v1150_v12  ;;  %v1738_v16 = vpop.f32.mrb[9].mxu0 }
 0x1fc   : > { %v1193_v19 = vpop.f32.mrb[10].mxu0 }
 0x1fd   : > { %v1194_v20 = vadd.f32 %v1193_v19, %v1153_v13  ;;  %v1739_v21 = vpop.f32.mrb[11].mxu0  ;;  %v1197_v22 = vmax.f32 %v1191_v15, 0.0 }
 0x1ff   : > { %v1198_v23 = vmax.f32 %v1194_v20, 0.0 }
 0x201   : > { %v1199_v24 = vpack.c.bf16 %v1198_v23, %v1197_v22 }
 0x203   : > { %1757 = vmatmul.mubr.bf16.vlgmr.msra.gmra.mrb[8].mxu1 %v1199_v24 }
 0x2d6   : > { %v1307_v26 = vpop.f32.mrb[8].mxu1 }
 0x2d7   : > { %v1308_v27 = vadd.f32 %v1595_v25, %v1307_v26  ;;  %v1758_v28 = vpop.f32.mrb[9].mxu1 }
 0x2d8   : > { %v1310_v29 = vpop.f32.mrb[10].mxu1 }
 0x2d9   : > { %v1316_v30 = vadd.f32 %v1308_v27, %v2497_v17  ;;  %v1311_v31 = vadd.f32 %v1595_v25, %v1310_v29  ;;  %v1759_v32 = vpop.f32.mrb[11].mxu1 }
 0x2db   : > { %v1317_v33 = vadd.f32 %v1311_v31, %v2499_v18  ;;  %1318 = vadd.xlane.f32.xlu0 %v1316_v30  ;;  %v1324_v34 = vmul.f32 %v1316_v30, %v1316_v30 }
 0x2dd   : > { %1326 = vadd.xlane.f32.xlu1 %v1324_v34  ;;  %v1325_v35 = vmul.f32 %v1317_v33, %v1317_v33 }
 0x2df   : > { %1320 = vadd.xlane.f32.xlu0 %v1317_v33 }
 0x2e1   : > { %1328 = vadd.xlane.f32.xlu1 %v1325_v35 }
 0x368   : > { %v1319_v36 = vpop.xlane.xlu0 %1318 }
 0x369   : > { %v1322_v37 = vmul.f32 0.03125, %v1319_v36 }
 0x36a   : > { %v1327_v39 = vpop.xlane.xlu1 %1326 }
 0x36b   : > { %v1332_v40 = vmul.f32 %v1322_v37, %v1322_v37  ;;  %v1330_v41 = vmul.f32 0.03125, %v1327_v39  ;;  %v1336_v48 = vsub.f32 %v1316_v30, %v1322_v37 }
 0x36c   : > { %v1321_v42 = vpop.xlane.xlu0 %1320 }
 0x36d   : > { %v1334_v38 = vsub.f32 %v1330_v41, %v1332_v40  ;;  %v1323_v17 = vmul.f32 0.03125, %v1321_v42 }
 0x36e   : > { %v1329_v43 = vpop.xlane.xlu1 %1328 }
 0x36f   : > { %v1338_v44 = vadd.f32 1e-05, %v1334_v38  ;;  %v1333_v45 = vmul.f32 %v1323_v17, %v1323_v17  ;;  %v1331_v18 = vmul.f32 0.03125, %v1329_v43  ;;  %v1337_v54 = vsub.f32 %v1317_v33, %v1323_v17 }
 0x371   : > { %1956 = vrsqrt.f32 %v1338_v44  ;;  %v1335_v46 = vsub.f32 %v1331_v18, %v1333_v45 }
 0x373   : > { %v1339_v47 = vadd.f32 1e-05, %v1335_v46 }
 0x375   : > { %1958 = vrsqrt.f32 %v1339_v47 }
 0x37b   : > { %v1957_v49 = vpop.eup %1956 }
 0x37c   : > { %v1342_v51 = vmul.f32 %v1957_v49, %v1336_v48 }
 0x37e   : > { %v1351_v53 = vmul.f32 %v1604_v50, %v1342_v51 }
 0x37f   : > { %v1959_v55 = vpop.eup %1958 }
 0x380   : > { %v1343_v56 = vmul.f32 %v1959_v55, %v1337_v54  ;;  %v1360_v57 = vadd.f32 %v1605_v52, %v1351_v53 }
 0x382   : > { %v1352_v58 = vmul.f32 %v1604_v50, %v1343_v56  ;;  %1362 = vst [vmem:[%s2464_s1] sm:$0xff] %v1360_v57 }
 0x384   : > { %v1361_v59 = vadd.f32 %v1605_v52, %v1352_v58 }
 0x386   : > { %1363 = vst [vmem:[%s2464_s1 + $0x8] sm:$0xff] %v1361_v59 }
 0x387   : > { %2110 = shalt.err (!%p2107_p2)
}
 0x388   : > { %s2111_s1 = scalar_lea.hbm %s2543_s14, 256  ;;  %s2115_s17 = scalar_lea.hbm %s2609_s7, 1536 }
 0x389   : > { %p2112_p1 = scmp.ne.s32.totalorder %s2543_s14, %s2111_s1  ;;  %p2116_p5 = scmp.lt.u32.totalorder %s2543_s14, %s2609_s7 }
 0x38a   : > { %p2117_p7 = scmp.lt.u32.totalorder %s2115_s17, %s2111_s1  ;;  %p2119_p3 = scmp.lt.u32.totalorder %s2111_s1, %s2543_s14 }
 0x38b   : > { %p2113_p4 = pnand %p2112_p1, %p2643_p12 }
 0x38c   : > { %p2118_p9 = por %p2117_p7, %p2116_p5 }
 0x38d   : > { %p2114_p6 = pneg %p2113_p4 }
 0x38e   : > { %p2120_p11 = por %p2119_p3, %p2118_p9 }
 0x390   : > { %p2121_p13 = pnand %p2120_p11, %p2114_p6 }
 0x392   : > { %2124 = shalt.err (!%p2121_p13)
}
 0x393   : > { %s2224_s21 = smov 128   ;;  %s2225_s10 = smov 8  }
 0x394   : > { %1777 = dma.vmem_to_hbm [thread:$0]  (%p2643_p12), %s2545_s28, 256, %s2543_s14, %s2550_s16, %s2224_s21, %s2224_s21, %s2225_s10  }
 0x395 PF: > { %s2644_s12 = sld [smem:[#allocation31_spill]]  ;;  %p1798_p8 = scmp.ge.s32.totalorder %s2209_s8, 2 }
 0x396   : > { %s1395_s29 = sand.u32 1, %s2181_s24  }
 0x397   : > { %s1396_s27 = scalar_lea.sflag [#allocation8], %s1395_s29 }
 0x39b   : > { %p2645_p0 = scmp.ne.s32.totalorder %s2644_s12, 0 }
 0x39d   : > { %p1787_p10 = pnand %p1798_p8, %p2645_p0 }
 0x39f   : > { %2176 = dma.done.wait (!%p1787_p10), %s1396_s27, 256  }
 0x3a0   : > { %2178 = vsyncadd (!%p1787_p10), %s1396_s27, 4294967040  ;;  %s22_s8 = sadd.s32 1, %s2209_s8   ;;  %s2646_s19 = sld [smem:[#allocation26_spill]] }
 0x3a1   : > { %p19_p2 = scmp.ge.s32.totalorder %s22_s8, 8   ;;  %s2647_s26 = sld [smem:[#allocation32_spill]] }
 0x3a2   : > { %s2648_s27 = sld [smem:[#allocation27_spill]]  ;;  %s2649_s28 = sld [smem:[#allocation28_spill]] }
 0x3a3   : > { %s2650_s29 = sld [smem:[#allocation29_spill]]  ;;  %s2651_s30 = sld [smem:[#allocation30_spill]] }
 0x3a4   : > { %s2652_s24 = smov %s2185_s25  ;;  %21 = sbr.rel (!%p19_p2) target bundleno = 10 (0xa), region = 133 }
 0x3a6   : > { %s2653_s25 = smov %s2646_s19 }
 0x3ab   :  { %1401 = vsyncpa [#allocation7], 1 }
 0x3ac   :  { %1403 = vsyncpa [#allocation7 + $0x1], 1 }
 0x3ad   :  { %1404 = vsyncpa [#allocation10], 1 }
 0x3ae   :  { %1405 = vsyncpa [#allocation8], 1 }
 0x3af   :  { %1407 = vsyncpa [#allocation8 + $0x1], 1 }
 0x3b0   :  { %1408 = vsyncmov [#allocation4] }
 0x3b3   :  { %s1409_s15 = vpop.sfrf %1408 }
 0x3b4   :  { %p1611_p12 = scmp.ne.s32.totalorder %s1409_s15, 0 }
 0x3b6   :  { %1413 = shalt.err (%p1611_p12)  }
 0x3b7   :  { %1415 = vsyncmov [#allocation4 + $0x1] }
 0x3ba   :  { %s1416_s3 = vpop.sfrf %1415 }
 0x3bb   :  { %p1612_p1 = scmp.ne.s32.totalorder %s1416_s3, 0 }
 0x3bd   :  { %1420 = shalt.err (%p1612_p1)  }
 0x3be   :  { %1422 = vsyncmov [#allocation4 + $0x2] }
 0x3c1   :  { %s1423_s14 = vpop.sfrf %1422 }
 0x3c2   :  { %p1613_p4 = scmp.ne.s32.totalorder %s1423_s14, 0 }
 0x3c4   :  { %1427 = shalt.err (%p1613_p4)  }

</bundles_post_ra>
